<compile_context>
chip_gen: v7x
topology: tpu7x:2x2x1
jax: 0.10.0
libtpu: 0.0.40
codegen_flags: <defaults>
</compile_context>

<pallas_src>
import jax
import jax.numpy as jnp
from jax.experimental import pallas as pl
from jax.experimental.pallas import tpu as pltpu

LANE = 128          # TPU lane width (last-dim alignment target)
TILE_B = 256        # batch rows per grid step (multiple of MXU M dim, small VMEM footprint)


def _round_up(x, m):
    return (x + m - 1) // m * m


def mlp_kernel(x_ref,
               w1_ref, b1_ref,
               w2_ref, b2_ref,
               w3_ref, b3_ref,
               w4_ref, b4_ref,
               w5_ref, b5_ref,
               o_ref):
    """One batch tile of the fused MLP. Weights/biases are resident VMEM blocks."""
    h = x_ref[...]
    # fc1 + ReLU
    h = jnp.dot(h, w1_ref[...], preferred_element_type=jnp.float32) + b1_ref[...]
    h = jnp.maximum(h, 0.0)
    # fc2 + ReLU
    h = jnp.dot(h, w2_ref[...], preferred_element_type=jnp.float32) + b2_ref[...]
    h = jnp.maximum(h, 0.0)
    # fc3 + ReLU
    h = jnp.dot(h, w3_ref[...], preferred_element_type=jnp.float32) + b3_ref[...]
    h = jnp.maximum(h, 0.0)
    # fc4 + ReLU
    h = jnp.dot(h, w4_ref[...], preferred_element_type=jnp.float32) + b4_ref[...]
    h = jnp.maximum(h, 0.0)
    # fc5 (no activation); output tile is lane-dense (TILE_B, 128)
    h = jnp.dot(h, w5_ref[...], preferred_element_type=jnp.float32) + b5_ref[...]
    o_ref[...] = h.astype(o_ref.dtype)


def init_linear_params(key, in_features, out_features):
    """Deterministic init mimicking torch.nn.Linear default (uniform +-1/sqrt(in))."""
    kw, kb = jax.random.split(key)
    bound = 1.0 / jnp.sqrt(jnp.float32(in_features))
    # Stored already transposed: [in, out]
    w = jax.random.uniform(kw, (in_features, out_features), jnp.float32,
                           minval=-bound, maxval=bound)
    b = jax.random.uniform(kb, (1, out_features), jnp.float32,
                           minval=-bound, maxval=bound)
    return w, b


def layer_dims(n_pairs):
    d0 = n_pairs
    d1 = max(1, n_pairs // 4)
    d2 = max(1, n_pairs // 16)
    d3 = max(1, n_pairs // 64)
    d4 = max(1, n_pairs // 64)
    d5 = 1
    return [(d0, d1), (d1, d2), (d2, d3), (d3, d4), (d4, d5)]


def make_params(key, n_pairs):
    dims = layer_dims(n_pairs)
    keys = jax.random.split(key, len(dims))
    params = []
    for k, (din, dout) in zip(keys, dims):
        params.extend(init_linear_params(k, din, dout))
    return params, dims  # params = [w1, b1, ..., w5, b5]


def pad_params_for_kernel(params, dims):
    """Zero-pad every layer's in/out dims up to LANE multiples (exact math: zero
    weight rows/cols + zero biases contribute nothing, ReLU(0)=0)."""
    padded = []
    for idx, (din, dout) in enumerate(dims):
        w = params[2 * idx]
        b = params[2 * idx + 1]
        din_p = _round_up(din, LANE)
        dout_p = _round_up(dout, LANE)
        w_p = jnp.zeros((din_p, dout_p), jnp.float32).at[:din, :dout].set(w)
        b_p = jnp.zeros((1, dout_p), jnp.float32).at[:, :dout].set(b)
        padded.extend([w_p, b_p])
    return padded


def neural_net_forward(x, params, dims):
    batch, n_feat = x.shape
    d_in_p = _round_up(dims[0][0], LANE)
    d_out = dims[-1][1]
    d_out_p = _round_up(d_out, LANE)

    padded_params = pad_params_for_kernel(params, dims)

    # Pad batch to a multiple of TILE_B and features to a lane multiple.
    batch_p = _round_up(batch, TILE_B)
    x_p = jnp.zeros((batch_p, d_in_p), jnp.float32).at[:batch, :n_feat].set(x)
    num_tiles = batch_p // TILE_B

    # x / out are tiled over the batch grid; weights & biases stay resident.
    in_specs = [pl.BlockSpec((TILE_B, d_in_p), lambda i: (i, 0))]
    for p in padded_params:
        in_specs.append(pl.BlockSpec(p.shape, lambda i: (0, 0)))
    out_spec = pl.BlockSpec((TILE_B, d_out_p), lambda i: (i, 0))

    flops = 2 * batch_p * sum(_round_up(di, LANE) * _round_up(do, LANE)
                              for di, do in dims)
    bytes_accessed = (x_p.size + sum(int(p.size) for p in padded_params)
                      + batch_p * d_out_p) * 4
    cost = pl.CostEstimate(flops=flops, transcendentals=0,
                           bytes_accessed=bytes_accessed)

    out_padded = pl.pallas_call(
        mlp_kernel,
        out_shape=jax.ShapeDtypeStruct((batch_p, d_out_p), jnp.float32),
        grid=(num_tiles,),
        in_specs=in_specs,
        out_specs=out_spec,
        compiler_params=pltpu.CompilerParams(
            dimension_semantics=("parallel",),
            vmem_limit_bytes=32 * 1024 * 1024),
        cost_estimate=cost,
    )(x_p, *padded_params)

    # Strip batch padding and the lane padding of the final layer.
    return out_padded[:batch, :d_out]


def reference_forward(x, params):
    w1, b1, w2, b2, w3, b3, w4, b4, w5, b5 = params
    h = jnp.maximum(x @ w1 + b1, 0.0)
    h = jnp.maximum(h @ w2 + b2, 0.0)
    h = jnp.maximum(h @ w3 + b3, 0.0)
    h = jnp.maximum(h @ w4 + b4, 0.0)
    return h @ w5 + b5


if __name__ == "__main__":
    n_pairs = 256   # -> true hidden dims 64, 16, 4, 4, 1 (padded to 128 in-kernel)
    batch = 512     # 2 grid steps of TILE_B=256

    key = jax.random.PRNGKey(0)
    k_x, k_p = jax.random.split(key)
    x = jax.random.normal(k_x, (batch, n_pairs), jnp.float32)
    params, dims = make_params(k_p, n_pairs)

    out = neural_net_forward(x, params, dims)
    out = jax.block_until_ready(out)

    ref = reference_forward(x, params)
    assert out.shape == (batch, 1), out.shape
    assert jnp.allclose(out, ref, atol=1e-4, rtol=1e-4), "mismatch vs reference"

    print("KERNEL_OK")
</pallas_src>

<mosaic_0001>
module attributes {stable_mosaic.version = 11 : i64} {
  func.func @mlp_kernel(%arg0: i32, %arg1: memref<256x256xf32, #tpu.memory_space<vmem>>, %arg2: memref<256x128xf32, #tpu.memory_space<vmem>>, %arg3: memref<1x128xf32, #tpu.memory_space<vmem>>, %arg4: memref<128x128xf32, #tpu.memory_space<vmem>>, %arg5: memref<1x128xf32, #tpu.memory_space<vmem>>, %arg6: memref<128x128xf32, #tpu.memory_space<vmem>>, %arg7: memref<1x128xf32, #tpu.memory_space<vmem>>, %arg8: memref<128x128xf32, #tpu.memory_space<vmem>>, %arg9: memref<1x128xf32, #tpu.memory_space<vmem>>, %arg10: memref<128x128xf32, #tpu.memory_space<vmem>>, %arg11: memref<1x128xf32, #tpu.memory_space<vmem>>, %arg12: memref<256x128xf32, #tpu.memory_space<vmem>>) attributes {dimension_semantics = [#tpu.dimension_semantics<parallel>], iteration_bounds = array<i64: 2>, scalar_prefetch = 0 : i64, scratch_operands = 0 : i64, tpu.core_type = #tpu.core_type<tc>, window_params = [{transform_indices = @transform_0, window_bounds = array<i64: 256, 256>}, {pipeline_mode = #tpu.pipeline_mode<synchronous>, transform_indices = @transform_1, window_bounds = array<i64: 256, 128>}, {pipeline_mode = #tpu.pipeline_mode<synchronous>, transform_indices = @transform_2, window_bounds = array<i64: 1, 128>}, {pipeline_mode = #tpu.pipeline_mode<synchronous>, transform_indices = @transform_3, window_bounds = array<i64: 128, 128>}, {pipeline_mode = #tpu.pipeline_mode<synchronous>, transform_indices = @transform_4, window_bounds = array<i64: 1, 128>}, {pipeline_mode = #tpu.pipeline_mode<synchronous>, transform_indices = @transform_5, window_bounds = array<i64: 128, 128>}, {pipeline_mode = #tpu.pipeline_mode<synchronous>, transform_indices = @transform_6, window_bounds = array<i64: 1, 128>}, {pipeline_mode = #tpu.pipeline_mode<synchronous>, transform_indices = @transform_7, window_bounds = array<i64: 128, 128>}, {pipeline_mode = #tpu.pipeline_mode<synchronous>, transform_indices = @transform_8, window_bounds = array<i64: 1, 128>}, {pipeline_mode = #tpu.pipeline_mode<synchronous>, transform_indices = @transform_9, window_bounds = array<i64: 128, 128>}, {pipeline_mode = #tpu.pipeline_mode<synchronous>, transform_indices = @transform_10, window_bounds = array<i64: 1, 128>}, {transform_indices = @transform_11, window_bounds = array<i64: 256, 128>}]} {
    %c0 = arith.constant 0 : index
    %c0_0 = arith.constant 0 : index
    %0 = vector.load %arg1[%c0, %c0_0] : memref<256x256xf32, #tpu.memory_space<vmem>>, vector<256x256xf32>
    %c0_1 = arith.constant 0 : index
    %c0_2 = arith.constant 0 : index
    %1 = vector.load %arg2[%c0_1, %c0_2] : memref<256x128xf32, #tpu.memory_space<vmem>>, vector<256x128xf32>
    %cst = arith.constant dense<0.000000e+00> : vector<256x128xf32>
    %2 = tpu.matmul %0, %1, %cst {dimension_numbers = #tpu.dot_dimension_numbers<[1], [0], [0], [1], [0, 0, 1, 1], [], []>} : vector<256x256xf32>, vector<256x128xf32>, vector<256x128xf32> -> vector<256x128xf32>
    %c0_3 = arith.constant 0 : index
    %c0_4 = arith.constant 0 : index
    %3 = vector.load %arg3[%c0_3, %c0_4] : memref<1x128xf32, #tpu.memory_space<vmem>>, vector<1x128xf32>
    %4 = vector.broadcast %3 : vector<1x128xf32> to vector<256x128xf32>
    %5 = arith.addf %2, %4 : vector<256x128xf32>
    %cst_5 = arith.constant 0.000000e+00 : f32
    %6 = vector.broadcast %cst_5 : f32 to vector<256x128xf32>
    %7 = arith.maximumf %5, %6 : vector<256x128xf32>
    %c0_6 = arith.constant 0 : index
    %c0_7 = arith.constant 0 : index
    %8 = vector.load %arg4[%c0_6, %c0_7] : memref<128x128xf32, #tpu.memory_space<vmem>>, vector<128x128xf32>
    %cst_8 = arith.constant dense<0.000000e+00> : vector<256x128xf32>
    %9 = tpu.matmul %7, %8, %cst_8 {dimension_numbers = #tpu.dot_dimension_numbers<[1], [0], [0], [1], [0, 0, 1, 1], [], []>} : vector<256x128xf32>, vector<128x128xf32>, vector<256x128xf32> -> vector<256x128xf32>
    %c0_9 = arith.constant 0 : index
    %c0_10 = arith.constant 0 : index
    %10 = vector.load %arg5[%c0_9, %c0_10] : memref<1x128xf32, #tpu.memory_space<vmem>>, vector<1x128xf32>
    %11 = vector.broadcast %10 : vector<1x128xf32> to vector<256x128xf32>
    %12 = arith.addf %9, %11 : vector<256x128xf32>
    %cst_11 = arith.constant 0.000000e+00 : f32
    %13 = vector.broadcast %cst_11 : f32 to vector<256x128xf32>
    %14 = arith.maximumf %12, %13 : vector<256x128xf32>
    %c0_12 = arith.constant 0 : index
    %c0_13 = arith.constant 0 : index
    %15 = vector.load %arg6[%c0_12, %c0_13] : memref<128x128xf32, #tpu.memory_space<vmem>>, vector<128x128xf32>
    %cst_14 = arith.constant dense<0.000000e+00> : vector<256x128xf32>
    %16 = tpu.matmul %14, %15, %cst_14 {dimension_numbers = #tpu.dot_dimension_numbers<[1], [0], [0], [1], [0, 0, 1, 1], [], []>} : vector<256x128xf32>, vector<128x128xf32>, vector<256x128xf32> -> vector<256x128xf32>
    %c0_15 = arith.constant 0 : index
    %c0_16 = arith.constant 0 : index
    %17 = vector.load %arg7[%c0_15, %c0_16] : memref<1x128xf32, #tpu.memory_space<vmem>>, vector<1x128xf32>
    %18 = vector.broadcast %17 : vector<1x128xf32> to vector<256x128xf32>
    %19 = arith.addf %16, %18 : vector<256x128xf32>
    %cst_17 = arith.constant 0.000000e+00 : f32
    %20 = vector.broadcast %cst_17 : f32 to vector<256x128xf32>
    %21 = arith.maximumf %19, %20 : vector<256x128xf32>
    %c0_18 = arith.constant 0 : index
    %c0_19 = arith.constant 0 : index
    %22 = vector.load %arg8[%c0_18, %c0_19] : memref<128x128xf32, #tpu.memory_space<vmem>>, vector<128x128xf32>
    %cst_20 = arith.constant dense<0.000000e+00> : vector<256x128xf32>
    %23 = tpu.matmul %21, %22, %cst_20 {dimension_numbers = #tpu.dot_dimension_numbers<[1], [0], [0], [1], [0, 0, 1, 1], [], []>} : vector<256x128xf32>, vector<128x128xf32>, vector<256x128xf32> -> vector<256x128xf32>
    %c0_21 = arith.constant 0 : index
    %c0_22 = arith.constant 0 : index
    %24 = vector.load %arg9[%c0_21, %c0_22] : memref<1x128xf32, #tpu.memory_space<vmem>>, vector<1x128xf32>
    %25 = vector.broadcast %24 : vector<1x128xf32> to vector<256x128xf32>
    %26 = arith.addf %23, %25 : vector<256x128xf32>
    %cst_23 = arith.constant 0.000000e+00 : f32
    %27 = vector.broadcast %cst_23 : f32 to vector<256x128xf32>
    %28 = arith.maximumf %26, %27 : vector<256x128xf32>
    %c0_24 = arith.constant 0 : index
    %c0_25 = arith.constant 0 : index
    %29 = vector.load %arg10[%c0_24, %c0_25] : memref<128x128xf32, #tpu.memory_space<vmem>>, vector<128x128xf32>
    %cst_26 = arith.constant dense<0.000000e+00> : vector<256x128xf32>
    %30 = tpu.matmul %28, %29, %cst_26 {dimension_numbers = #tpu.dot_dimension_numbers<[1], [0], [0], [1], [0, 0, 1, 1], [], []>} : vector<256x128xf32>, vector<128x128xf32>, vector<256x128xf32> -> vector<256x128xf32>
    %c0_27 = arith.constant 0 : index
    %c0_28 = arith.constant 0 : index
    %31 = vector.load %arg11[%c0_27, %c0_28] : memref<1x128xf32, #tpu.memory_space<vmem>>, vector<1x128xf32>
    %32 = vector.broadcast %31 : vector<1x128xf32> to vector<256x128xf32>
    %33 = arith.addf %30, %32 : vector<256x128xf32>
    %c0_29 = arith.constant 0 : index
    %c0_30 = arith.constant 0 : index
    %34 = vector.load %arg12[%c0_29, %c0_30] : memref<256x128xf32, #tpu.memory_space<vmem>>, vector<256x128xf32>
    tpu.vector_store %arg12[%c0_29, %c0_30], %33 {strides = array<i32>} : memref<256x128xf32, #tpu.memory_space<vmem>>, vector<256x128xf32>,
    return
  }
  func.func @transform_0(%arg0: i32) -> (i32, i32) {
    %c0_i32 = arith.constant 0 : i32
    %c0_i32_0 = arith.constant 0 : i32
    return %arg0, %c0_i32 : i32, i32
  }
  func.func @transform_1(%arg0: i32) -> (i32, i32) {
    %c0_i32 = arith.constant 0 : i32
    %c0_i32_0 = arith.constant 0 : i32
    %c0_i32_1 = arith.constant 0 : i32
    return %c0_i32, %c0_i32_0 : i32, i32
  }
  func.func @transform_2(%arg0: i32) -> (i32, i32) {
    %c0_i32 = arith.constant 0 : i32
    %c0_i32_0 = arith.constant 0 : i32
    %c0_i32_1 = arith.constant 0 : i32
    return %c0_i32, %c0_i32_0 : i32, i32
  }
  func.func @transform_3(%arg0: i32) -> (i32, i32) {
    %c0_i32 = arith.constant 0 : i32
    %c0_i32_0 = arith.constant 0 : i32
    %c0_i32_1 = arith.constant 0 : i32
    return %c0_i32, %c0_i32_0 : i32, i32
  }
  func.func @transform_4(%arg0: i32) -> (i32, i32) {
    %c0_i32 = arith.constant 0 : i32
    %c0_i32_0 = arith.constant 0 : i32
    %c0_i32_1 = arith.constant 0 : i32
    return %c0_i32, %c0_i32_0 : i32, i32
  }
  func.func @transform_5(%arg0: i32) -> (i32, i32) {
    %c0_i32 = arith.constant 0 : i32
    %c0_i32_0 = arith.constant 0 : i32
    %c0_i32_1 = arith.constant 0 : i32
    return %c0_i32, %c0_i32_0 : i32, i32
  }
  func.func @transform_6(%arg0: i32) -> (i32, i32) {
    %c0_i32 = arith.constant 0 : i32
    %c0_i32_0 = arith.constant 0 : i32
    %c0_i32_1 = arith.constant 0 : i32
    return %c0_i32, %c0_i32_0 : i32, i32
  }
  func.func @transform_7(%arg0: i32) -> (i32, i32) {
    %c0_i32 = arith.constant 0 : i32
    %c0_i32_0 = arith.constant 0 : i32
    %c0_i32_1 = arith.constant 0 : i32
    return %c0_i32, %c0_i32_0 : i32, i32
  }
  func.func @transform_8(%arg0: i32) -> (i32, i32) {
    %c0_i32 = arith.constant 0 : i32
    %c0_i32_0 = arith.constant 0 : i32
    %c0_i32_1 = arith.constant 0 : i32
    return %c0_i32, %c0_i32_0 : i32, i32
  }
  func.func @transform_9(%arg0: i32) -> (i32, i32) {
    %c0_i32 = arith.constant 0 : i32
    %c0_i32_0 = arith.constant 0 : i32
    %c0_i32_1 = arith.constant 0 : i32
    return %c0_i32, %c0_i32_0 : i32, i32
  }
  func.func @transform_10(%arg0: i32) -> (i32, i32) {
    %c0_i32 = arith.constant 0 : i32
    %c0_i32_0 = arith.constant 0 : i32
    %c0_i32_1 = arith.constant 0 : i32
    return %c0_i32, %c0_i32_0 : i32, i32
  }
  func.func @transform_11(%arg0: i32) -> (i32, i32) {
    %c0_i32 = arith.constant 0 : i32
    %c0_i32_0 = arith.constant 0 : i32
    return %arg0, %c0_i32 : i32, i32
  }
}

</mosaic_0001>

<bundles_post_ra>
// kernel: tpu_custom_call.1
= control target key start
LH: loop header
LB: loop body
LE: loop exit
PB: predicated region body
PF: predicated region fallthrough
CT: control target
= control target key end

     0   :  { %s3880_s0 = inlined_call_operand.hbm [shape: f32[512,256], index: 0, kind: input, shape index: {}]   ;;  %s3881_s1 = inlined_call_operand.hbm [shape: f32[256,128], index: 1, kind: input, shape index: {}]   ;;  %s3882_s2 = inlined_call_operand.vmem [shape: f32[1,128], index: 2, kind: input, shape index: {}]   ;;  %s3883_s3 = inlined_call_operand.hbm [shape: f32[128,128], index: 3, kind: input, shape index: {}]   ;;  %s3884_s4 = inlined_call_operand.vmem [shape: f32[1,128], index: 4, kind: input, shape index: {}]   ;;  %s3885_s5 = inlined_call_operand.hbm [shape: f32[128,128], index: 5, kind: input, shape index: {}]   ;;  %s3886_s6 = inlined_call_operand.vmem [shape: f32[1,128], index: 6, kind: input, shape index: {}]   ;;  %s3887_s7 = inlined_call_operand.hbm [shape: f32[128,128], index: 7, kind: input, shape index: {}]   ;;  %s3888_s8 = inlined_call_operand.vmem [shape: f32[1,128], index: 8, kind: input, shape index: {}]   ;;  %s3889_s9 = inlined_call_operand.hbm [shape: f32[128,128], index: 9, kind: input, shape index: {}]   ;;  %s3890_s10 = inlined_call_operand.vmem [shape: f32[1,128], index: 10, kind: input, shape index: {}]   ;;  %s3891_s11 = inlined_call_operand.hbm [shape: f32[512,128], index: 11, kind: output, shape index: {}]  }
   0x1   :  { %3896 = sst [smem:[#allocation19_spill]] %s3881_s1 }
   0x2   :  { %3897 = sst [smem:[#allocation20_spill]] %s3888_s8 }
   0x3   :  { %3898 = sst [smem:[#allocation21_spill]] %s3890_s10 }
   0x4   :  { %3899 = sst [smem:[#allocation22_spill]] %s3891_s11 }
   0x5   :  { %16 = vsyncpa [#allocation3], 0 }
   0x6   :  { %18 = vsyncpa [#allocation3 + $0x1], 0 }
   0x7   :  { %19 = vsyncpa [#allocation6], 0 }
   0x8   :  { %20 = vsyncpa [#allocation9], 0 }
   0x9   :  { %21 = vsyncpa [#allocation12], 0 }
   0xa   :  { %22 = vsyncpa [#allocation4], 0 }
   0xb   :  { %24 = vsyncpa [#allocation4 + $0x1], 0  ;;  %s3261_s17 = smov 0   ;;  %s3263_s18 = smov 0  }
   0xc   :  { %s3265_s19 = smov 0   ;;  %s3267_s20 = smov 0  }
   0xd LB: > { %s3187_s21 = smov [#allocation5]   ;;  %s3282_s23 = sadd.s32 4294967295, %s3185_s20   ;;  %s3185_s20 = sphi %s3267_s20, %s3925_s20   ;;  %s3181_s19 = sphi %s3265_s19, %s3924_s19   ;;  %s3177_s18 = sphi %s3263_s18, %s3923_s18   ;;  %s3173_s17 = sphi %s3261_s17, %s3922_s17  }
   0xe   : > { %s309_s22 = sshll.u32 %s3187_s21, 4  ;;  %p2097_p0 = scmp.ge.s32.totalorder %s3185_s20, 1  ;;  %s3287_s22 = int_to_ptr.vmem [resolvable:$true] %s309_s22 }
   0xf   : > { %p3893_p1 = scmp.eq.s32.totalorder %s3282_s23, 0  ;;  %p297_p2 = scmp.lt.s32.totalorder %s3185_s20, 3 }
  0x10   : > { %s3188_s25 = smov [#allocation8]   ;;  %s3189_s28 = smov [#allocation7]  }
  0x11   : > { %p3289_p3 = pnand %p2097_p0, %p297_p2  ;;  %s341_s26 = sshll.u32 %s3188_s25, 4  ;;  %s3302_s26 = int_to_ptr.vmem [resolvable:$true] %s341_s26 }
  0x12   : > { %s325_s29 = sshll.u32 %s3189_s28, 4  ;;  %s3902_s1 = sld [smem:[#allocation19_spill]]  ;;  %s3304_s29 = int_to_ptr.vmem [resolvable:$true] %s325_s29 }
  0x13   : > { %s3900_s24 = scalar_select %p3289_p3, 1, 0 }
  0x14   : > { %p2857_p5 = pneg %p3289_p3 }
  0x16   : > { %p3298_p6 = pnand %p2857_p5, %p3893_p1 }
  0x18   : > { %s2937_s13 = scalar_lea.hbm %s3902_s1, 4096  ;;  %p3314_p8 = pneg %p3298_p6 }
  0x19   : > { %p2938_p7 = scmp.ne.s32.totalorder %s3902_s1, %s2937_s13  ;;  %p2944_p11 = scmp.lt.u32.totalorder %s2937_s13, %s3902_s1 }
  0x1b   : > { %p2940_p9 = pnand %p3314_p8, %p2938_p7 }
  0x1d   : > { %p2941_p10 = pneg %p2940_p9 }
  0x1f   : > { %p2946_p12 = pnand %p2944_p11, %p2941_p10 }
  0x21   : > { %2949 = shalt.err (!%p2946_p12)
}
  0x22   : > { %s2950_s28 = scalar_lea.vmem %s3287_s22, 4096  ;;  %p2958_p5 = scmp.lt.s32.totalorder %s3287_s22, %s3287_s22 }
  0x23   : > { %p2951_p13 = scmp.ne.s32.totalorder %s3287_s22, %s2950_s28  ;;  %p2959_p4 = scmp.lt.s32.totalorder %s2950_s28, %s2950_s28 }
  0x25   : > { %p2953_p0 = pnand %p2951_p13, %p3314_p8  ;;  %p2960_p7 = por %p2959_p4, %p2958_p5 }
  0x27   : > { %p2954_p2 = pneg %p2953_p0 }
  0x29   : > { %p2961_p9 = pnand %p2960_p7, %p2954_p2 }
  0x2b   : > { %2964 = shalt.err (!%p2961_p9)
}
  0x2c   : > { %s3190_s30 = smov 128   ;;  %s3191_s12 = smov 8  }
  0x2d   : > { %2860 = dma.hbm_to_vmem [thread:$0]  (!%p3298_p6), %s3902_s1, 4096, %s3287_s22, [#allocation6], %s3190_s30, %s3190_s30, %s3191_s12  }
  0x2e   : > { %s2965_s25 = scalar_lea.hbm %s3885_s5, 2048 }
  0x2f   : > { %p2966_p4 = scmp.ne.s32.totalorder %s3885_s5, %s2965_s25  ;;  %p2972_p12 = scmp.lt.u32.totalorder %s2965_s25, %s3885_s5 }
  0x31   : > { %p2968_p10 = pnand %p2966_p4, %p3314_p8 }
  0x33   : > { %p2969_p11 = pneg %p2968_p10 }
  0x35   : > { %p2974_p13 = pnand %p2972_p12, %p2969_p11 }
  0x37   : > { %2977 = shalt.err (!%p2974_p13)
}
  0x38   : > { %s2978_s22 = scalar_lea.vmem %s3302_s26, 2048  ;;  %p2986_p7 = scmp.lt.s32.totalorder %s3302_s26, %s3302_s26 }
  0x39   : > { %p2979_p0 = scmp.ne.s32.totalorder %s3302_s26, %s2978_s22  ;;  %p2987_p9 = scmp.lt.s32.totalorder %s2978_s22, %s2978_s22 }
  0x3b   : > { %p2981_p2 = pnand %p2979_p0, %p3314_p8  ;;  %p2988_p4 = por %p2987_p9, %p2986_p7 }
  0x3d   : > { %p2982_p5 = pneg %p2981_p2 }
  0x3f   : > { %p2989_p10 = pnand %p2988_p4, %p2982_p5 }
  0x41   : > { %2992 = shalt.err (!%p2989_p10)
}
  0x42   : > { %2866 = dma.hbm_to_vmem [thread:$0]  (!%p3298_p6), %s3885_s5, 2048, %s3302_s26, [#allocation9], %s3190_s30, %s3190_s30, %s3191_s12  }
  0x43   : > { %s2993_s14 = scalar_lea.hbm %s3883_s3, 2048 }
  0x44   : > { %p2994_p11 = scmp.ne.s32.totalorder %s3883_s3, %s2993_s14  ;;  %p3000_p0 = scmp.lt.u32.totalorder %s2993_s14, %s3883_s3 }
  0x46   : > { %p2996_p12 = pnand %p2994_p11, %p3314_p8 }
  0x48   : > { %p2997_p13 = pneg %p2996_p12 }
  0x4a   : > { %p3002_p2 = pnand %p3000_p0, %p2997_p13 }
  0x4c   : > { %3005 = shalt.err (!%p3002_p2)
}
  0x4d   : > { %s3006_s26 = scalar_lea.vmem %s3304_s29, 2048  ;;  %p3014_p4 = scmp.lt.s32.totalorder %s3304_s29, %s3304_s29 }
  0x4e   : > { %p3007_p5 = scmp.ne.s32.totalorder %s3304_s29, %s3006_s26  ;;  %p3015_p10 = scmp.lt.s32.totalorder %s3006_s26, %s3006_s26 }
  0x50   : > { %p3009_p7 = pnand %p3007_p5, %p3314_p8  ;;  %p3016_p11 = por %p3015_p10, %p3014_p4 }
  0x52   : > { %p3010_p9 = pneg %p3009_p7 }
  0x54   : > { %p3017_p12 = pnand %p3016_p11, %p3010_p9 }
  0x56   : > { %3020 = shalt.err (!%p3017_p12)
}
  0x57   : > { %2863 = dma.hbm_to_vmem [thread:$0]  (!%p3298_p6), %s3883_s3, 2048, %s3304_s29, [#allocation6], %s3190_s30, %s3190_s30, %s3191_s12  }
  0x58   : > { %s3192_s10 = smov [#allocation10]   ;;  %s3193_s13 = smov [#allocation11]  }
  0x59   : > { %s357_s11 = sshll.u32 %s3192_s10, 4  ;;  %s373_s14 = sshll.u32 %s3193_s13, 4  ;;  %s358_s11 = int_to_ptr.vmem [resolvable:$true] %s357_s11  ;;  %s374_s14 = int_to_ptr.vmem [resolvable:$true] %s373_s14 }
  0x5a   : > { %s3021_s25 = scalar_lea.hbm %s3887_s7, 2048 }
  0x5b   : > { %p3022_p13 = scmp.ne.s32.totalorder %s3887_s7, %s3021_s25  ;;  %p3028_p5 = scmp.lt.u32.totalorder %s3021_s25, %s3887_s7 }
  0x5d   : > { %p3024_p0 = pnand %p3022_p13, %p3314_p8 }
  0x5f   : > { %p3025_p2 = pneg %p3024_p0 }
  0x61   : > { %p3030_p7 = pnand %p3028_p5, %p3025_p2 }
  0x63   : > { %3033 = shalt.err (!%p3030_p7)
}
  0x64   : > { %s3034_s29 = scalar_lea.vmem %s358_s11, 2048  ;;  %p3042_p11 = scmp.lt.s32.totalorder %s358_s11, %s358_s11 }
  0x65   : > { %p3035_p9 = scmp.ne.s32.totalorder %s358_s11, %s3034_s29  ;;  %p3043_p12 = scmp.lt.s32.totalorder %s3034_s29, %s3034_s29 }
  0x67   : > { %p3037_p4 = pnand %p3035_p9, %p3314_p8  ;;  %p3044_p1 = por %p3043_p12, %p3042_p11 }
  0x69   : > { %p3038_p10 = pneg %p3037_p4 }
  0x6b   : > { %p3045_p3 = pnand %p3044_p1, %p3038_p10 }
  0x6d   : > { %3048 = shalt.err (!%p3045_p3)
}
  0x6e   : > { %2869 = dma.hbm_to_vmem [thread:$0]  (!%p3298_p6), %s3887_s7, 2048, %s358_s11, [#allocation9], %s3190_s30, %s3190_s30, %s3191_s12  }
  0x6f   : > { %s3049_s15 = scalar_lea.hbm %s3889_s9, 2048 }
  0x70   : > { %p3050_p1 = scmp.ne.s32.totalorder %s3889_s9, %s3049_s15  ;;  %p3056_p0 = scmp.lt.u32.totalorder %s3049_s15, %s3889_s9 }
  0x72   : > { %p3052_p3 = pnand %p3050_p1, %p3314_p8 }
  0x74   : > { %p3053_p13 = pneg %p3052_p3 }
  0x76   : > { %p3058_p2 = pnand %p3056_p0, %p3053_p13 }
  0x78   : > { %3061 = shalt.err (!%p3058_p2)
}
  0x79   : > { %s3062_s22 = scalar_lea.vmem %s374_s14, 2048  ;;  %p3070_p4 = scmp.lt.s32.totalorder %s374_s14, %s374_s14 }
  0x7a   : > { %p3063_p5 = scmp.ne.s32.totalorder %s374_s14, %s3062_s22  ;;  %p3071_p10 = scmp.lt.s32.totalorder %s3062_s22, %s3062_s22 }
  0x7c   : > { %p3065_p7 = pnand %p3063_p5, %p3314_p8  ;;  %p3072_p11 = por %p3071_p10, %p3070_p4 }
  0x7e   : > { %p3066_p9 = pneg %p3065_p7 }
  0x80   : > { %p3073_p12 = pnand %p3072_p11, %p3066_p9 }
  0x82   : > { %3076 = shalt.err (!%p3073_p12)
}
  0x83   : > { %2872 = dma.hbm_to_vmem [thread:$0]  (!%p3298_p6), %s3889_s9, 2048, %s374_s14, [#allocation12], %s3190_s30, %s3190_s30, %s3191_s12  }
  0x84   : > { %s2096_s27 = sadd.s32 4294967294, %s3185_s20   ;;  %s3434_s16 = sadd.s32 1, %s3185_s20  }
  0x85   : > { %s37_s1 = sadd.s32 1, %s3181_s19  ;;  %s34_s8 = ssub.s32 %s3185_s20, %s3434_s16 }
  0x86   : > { %p44_p8 = scmp.ne.s32.totalorder %s3181_s19, %s3177_s18  ;;  %p35_p1 = scmp.eq.s32.totalorder %s34_s8, 0 }
  0x87   : > { %p45_p3 = scmp.eq.s32.totalorder %s3185_s20, 0  ;;  %p50_p13 = scmp.ne.s32.totalorder %s3177_s18, %s3173_s17 }
  0x88   : > { %p284_p0 = scmp.eq.s32.totalorder %s3282_s23, 1  ;;  %p3904_p5 = scmp.eq.s32.totalorder %s3282_s23, 0 }
  0x89   : > { %s3446_s10 = scalar_select %p35_p1, %s3181_s19, %s37_s1  }
  0x8a   : > { %p46_p2 = por %p45_p3, %p44_p8  ;;  %p3450_p7 = por %p3904_p5, %p50_p13 }
  0x8b   : > { %p3454_p6 = por %p284_p0, %p44_p8  ;;  %p290_p9 = scmp.eq.s32.totalorder %s2096_s27, 1 }
  0x8c   : > { %p2886_p4 = scmp.lt.s32.totalorder %s3185_s20, 2  ;;  %s390_s12 = sand.u32 1, %s3181_s19  }
  0x8d   : > { %s3906_s30 = scalar_select %p3454_p6, 1, 0 }
  0x8e   : > { %p3460_p10 = por %p290_p9, %p50_p13  ;;  %s2104_s15 = sshll.u32 %s390_s12, 9 }
  0x8f   : > { %s2127_s21 = sshll.u32 %s3185_s20, 13  ;;  %s394_s22 = scalar_lea.vmem [#allocation2], %s2104_s15 }
  0x90   : > { %s3907_s14 = scalar_select %p3460_p10, 1, 0 }
  0x91   : > { %s3468_s26 = scalar_lea.hbm %s3880_s0, %s2127_s21  ;;  %s402_s11 = sshll.u32 %s394_s22, 4  ;;  %s3474_s11 = int_to_ptr.vmem [resolvable:$true] %s402_s11 }
  0x92   : > { %p3470_p11 = pnand %p2886_p4, %p46_p2  ;;  %s3476_s27 = scalar_lea.sflag [#allocation3], %s390_s12 }
  0x93   : > { %s3077_s1 = scalar_lea.hbm %s3468_s26, 8192  ;;  %s3082_s21 = scalar_lea.hbm %s3880_s0, 16384 }
  0x94   : > { %p3078_p12 = scmp.ne.s32.totalorder %s3468_s26, %s3077_s1  ;;  %p3079_p8 = pneg %p3470_p11 }
  0x95   : > { %p3083_p13 = scmp.lt.u32.totalorder %s3468_s26, %s3880_s0  ;;  %p3084_p0 = scmp.lt.u32.totalorder %s3082_s21, %s3077_s1 }
  0x96   : > { %p3080_p1 = pnand %p3079_p8, %p3078_p12  ;;  %p3086_p5 = scmp.lt.u32.totalorder %s3077_s1, %s3468_s26 }
  0x97   : > { %p3085_p2 = por %p3084_p0, %p3083_p13 }
  0x98   : > { %p3081_p3 = pneg %p3080_p1 }
  0x99   : > { %p3087_p9 = por %p3086_p5, %p3085_p2 }
  0x9b   : > { %p3088_p4 = pnand %p3087_p9, %p3081_p3 }
  0x9d   : > { %3091 = shalt.err (!%p3088_p4)
}
  0x9e   : > { %s3092_s12 = scalar_lea.vmem %s3474_s11, 8192  ;;  %s3194_s22 = smov [#allocation2]  }
  0x9f   : > { %p3093_p12 = scmp.ne.s32.totalorder %s3474_s11, %s3092_s12  ;;  %s3097_s8 = sshll.u32 %s3194_s22, 4  ;;  %s3098_s8 = int_to_ptr.vmem [resolvable:$false] %s3097_s8 }
  0xa0   : > { %s3099_s15 = scalar_lea.vmem %s3098_s8, 16384  ;;  %p3100_p6 = scmp.lt.s32.totalorder %s3474_s11, %s3098_s8 }
  0xa1   : > { %p3095_p1 = pnand %p3093_p12, %p3079_p8  ;;  %p3101_p13 = scmp.lt.s32.totalorder %s3099_s15, %s3092_s12 }
  0xa3   : > { %p3096_p10 = pneg %p3095_p1  ;;  %p3102_p0 = por %p3101_p13, %p3100_p6 }
  0xa5   : > { %p3103_p2 = pnand %p3102_p0, %p3096_p10 }
  0xa7   : > { %3106 = shalt.err (!%p3103_p2)
}
  0xa8   : > { %s3195_s1 = smov 256   ;;  %s3196_s21 = smov 16  }
  0xa9   : > { %2876 = dma.hbm_to_vmem [thread:$0]  (!%p3470_p11), %s3468_s26, 8192, %s3474_s11, %s3476_s27, %s3195_s1, %s3195_s1, %s3196_s21  }
  0xaa   : > { %p3909_p8 = scmp.ne.s32.totalorder %s3900_s24, 0 }
  0xab   : > { %s3507_s25 = sand.u32 (!%p3909_p8), 1, %s3177_s18  }
  0xac   : > { %414 = sbr.rel (%p3909_p8) target bundleno = 1480 (0x5c8), region = 64  ;;  %s2109_s28 = sshll.u32 (!%p3909_p8), %s3507_s25, 9 }
  0xad   : > { %s417_s12 = scalar_lea.sflag (!%p3909_p8), [#allocation3], %s3507_s25  ;;  %s3511_s22 = scalar_lea.vmem (!%p3909_p8), [#allocation2], %s2109_s28 }
  0xb3   : > { %3152 = dma.done.wait (%p3450_p7), %s417_s12, 8192  }
  0xb4   : > { %3154 = vsyncadd (%p3450_p7), %s417_s12, 4294959104  ;;  %p3910_p6 = scmp.eq.s32.totalorder %s3282_s23, 0 }
  0xb6   : > { %3156 = dma.done.wait (%p3910_p6), [#allocation6], 6144   ;;  %p3911_p10 = pmov %p3910_p6 }
  0xb7   : > { %p3912_p11 = pmov %p3910_p6 }
  0xb8   : > { %3158 = vsyncadd (%p3911_p10), [#allocation6], 4294961152 }
  0xb9   : > { %3160 = dma.done.wait (%p3912_p11), [#allocation9], 4096   ;;  %p3913_p3 = pmov %p3910_p6 }
  0xbb   : > { %3162 = vsyncadd (%p3913_p3), [#allocation9], 4294963200  ;;  %p3914_p5 = pmov %p3913_p3 }
  0xbc   : > { %p3915_p9 = pmov %p3913_p3 }
  0xbd   : > { %3164 = dma.done.wait (%p3914_p5), [#allocation12], 2048  }
  0xbe   : > { %3166 = vsyncadd (%p3915_p9), [#allocation12], 4294965248  ;;  %v3197_v0 = vmov 0.0|0.0   ;;  %v545_v1 = vld [vmem:[#allocation5] sm:$0xff]  ;;  %v546_v2 = vld [vmem:[#allocation5 + $0x8] sm:$0xff]  ;;  %s3916_s1 = sld [smem:[#allocation20_spill]] }
  0xbf   : > { %2641 = vmatprep.subr.bf16.mxu0 %v3197_v0  ;;  %v547_v3 = vld [vmem:[#allocation5 + $0x10] sm:$0xff]  ;;  %v2642_v4 = vpack.c.bf16 %v546_v2, %v545_v1  ;;  %v548_v5 = vld [vmem:[#allocation5 + $0x18] sm:$0xff]  ;;  %v549_v7 = vld [vmem:[#allocation5 + $0x20] sm:$0xff]  ;;  %s2115_s21 = sshll.u32 %s3507_s25, 8  ;;  %s2128_s13 = sshll.u32 %s3282_s23, 12 }
  0xc0   : > { %v2645_v6 = vpack.c.bf16 %v548_v5, %v547_v3  ;;  %v550_v8 = vld [vmem:[#allocation5 + $0x28] sm:$0xff]  ;;  %v551_v10 = vld [vmem:[#allocation5 + $0x30] sm:$0xff]  ;;  %v552_v11 = vld [vmem:[#allocation5 + $0x38] sm:$0xff]  ;;  %s3765_s24 = scalar_lea.vmem [#allocation13], %s2115_s21  ;;  %s3918_s27 = sld [smem:[#allocation22_spill]] }
  0xc1   : > { %2643 = vmatpush1.bf16.msra.mxu0 %v2642_v4  ;;  %v2648_v9 = vpack.c.bf16 %v550_v8, %v549_v7  ;;  %v482_v12 = vld [vmem:[%s3511_s22 + $0x8] sm:$0xff]  ;;  %v2651_v13 = vpack.c.bf16 %v552_v11, %v551_v10  ;;  %v553_v14 = vld [vmem:[#allocation5 + $0x40] sm:$0xff]  ;;  %v555_v17 = vld [vmem:[#allocation5 + $0x50] sm:$0xff]  ;;  %s1975_s26 = sshll.u32 %s3765_s24, 4  ;;  %s1962_s23 = scalar_lea.sflag [#allocation4], %s3507_s25  ;;  %s3833_s26 = int_to_ptr.vmem [resolvable:$true] %s1975_s26 }
  0xc2   : > { %2644 = vmatprep.subr.bf16.mxu0 %v3197_v0  ;;  %648 = vmatprep.mubr.f32.mxu0 %v482_v12  ;;  %v554_v15 = vld [vmem:[#allocation5 + $0x48] sm:$0xff]  ;;  %v556_v18 = vld [vmem:[#allocation5 + $0x58] sm:$0xff]  ;;  %v557_v20 = vld [vmem:[#allocation5 + $0x60] sm:$0xff]  ;;  %s3107_s15 = scalar_lea.vmem %s3833_s26, 4096  ;;  %p3919_p4 = scmp.ne.s32.totalorder %s3906_s30, 0 }
  0xc3   : > { %v2654_v16 = vpack.c.bf16 %v554_v15, %v553_v14  ;;  %v2657_v19 = vpack.c.bf16 %v556_v18, %v555_v17  ;;  %v558_v21 = vld [vmem:[#allocation5 + $0x68] sm:$0xff]  ;;  %v559_v23 = vld [vmem:[#allocation5 + $0x70] sm:$0xff]  ;;  %v560_v24 = vld [vmem:[#allocation5 + $0x78] sm:$0xff]  ;;  %p3108_p7 = scmp.ne.s32.totalorder %s3833_s26, %s3107_s15 }
  0xc4   : > { %v2660_v22 = vpack.c.bf16 %v558_v21, %v557_v20  ;;  %v2663_v25 = vpack.c.bf16 %v560_v24, %v559_v23  ;;  %v561_v26 = vld [vmem:[#allocation5 + $0x80] sm:$0xff]  ;;  %v562_v27 = vld [vmem:[#allocation5 + $0x88] sm:$0xff]  ;;  %v563_v29 = vld [vmem:[#allocation5 + $0x90] sm:$0xff] }
  0xc5   : > { %2646 = vmatpush1.bf16.msra.mxu0 %v2645_v6  ;;  %v2666_v28 = vpack.c.bf16 %v562_v27, %v561_v26  ;;  %v564_v30 = vld [vmem:[#allocation5 + $0x98] sm:$0xff]  ;;  %v565_v32 = vld [vmem:[#allocation5 + $0xa0] sm:$0xff]  ;;  %v566_v33 = vld [vmem:[#allocation5 + $0xa8] sm:$0xff]  ;;  %p3109_p12 = pnand %p3108_p7, %p3919_p4 }
  0xc6   : > { %2647 = vmatprep.subr.bf16.mxu0 %v3197_v0  ;;  %v2669_v31 = vpack.c.bf16 %v564_v30, %v563_v29  ;;  %v2672_v34 = vpack.c.bf16 %v566_v33, %v565_v32  ;;  %v567_v35 = vld [vmem:[#allocation5 + $0xb0] sm:$0xff]  ;;  %v568_v36 = vld [vmem:[#allocation5 + $0xb8] sm:$0xff]  ;;  %v569_v38 = vld [vmem:[#allocation5 + $0xc0] sm:$0xff]  ;;  %s3831_s8 = scalar_lea.hbm %s3918_s27, %s2128_s13 }
  0xc7   : > { %v2675_v37 = vpack.c.bf16 %v568_v36, %v567_v35  ;;  %v570_v39 = vld [vmem:[#allocation5 + $0xc8] sm:$0xff]  ;;  %v571_v41 = vld [vmem:[#allocation5 + $0xd0] sm:$0xff]  ;;  %v572_v42 = vld [vmem:[#allocation5 + $0xd8] sm:$0xff]  ;;  %p3110_p1 = pneg %p3109_p12 }
  0xc8   : > { %v2678_v40 = vpack.c.bf16 %v570_v39, %v569_v38  ;;  %v2681_v43 = vpack.c.bf16 %v572_v42, %v571_v41  ;;  %v573_v44 = vld [vmem:[#allocation5 + $0xe0] sm:$0xff]  ;;  %v574_v45 = vld [vmem:[#allocation5 + $0xe8] sm:$0xff]  ;;  %v575_v47 = vld [vmem:[#allocation5 + $0xf0] sm:$0xff] }
  0xc9   : > { %2649 = vmatpush1.bf16.msra.mxu0 %v2648_v9  ;;  %v2684_v46 = vpack.c.bf16 %v574_v45, %v573_v44  ;;  %v576_v48 = vld [vmem:[#allocation5 + $0xf8] sm:$0xff]  ;;  %v841_v50 = vld [vmem:[#allocation7] sm:$0xff]  ;;  %v842_v51 = vld [vmem:[#allocation7 + $0x8] sm:$0xff] }
  0xca   : > { %2650 = vmatprep.subr.bf16.mxu0 %v3197_v0  ;;  %v2687_v49 = vpack.c.bf16 %v576_v48, %v575_v47  ;;  %v843_v52 = vld [vmem:[#allocation7 + $0x10] sm:$0xff]  ;;  %v481_v53 = vld [vmem:[%s3511_s22] sm:$0xff]  ;;  %v2689_v54 = vpack.c.bf16 %v842_v51, %v841_v50  ;;  %v844_v55 = vld [vmem:[#allocation7 + $0x18] sm:$0xff] }
  0xcb   : > { %v484_v56 = vld [vmem:[%s3511_s22 + $0x18] sm:$0xff]  ;;  %v2693_v57 = vpack.c.bf16 %v844_v55, %v843_v52  ;;  %v845_v58 = vld [vmem:[#allocation7 + $0x20] sm:$0xff]  ;;  %v846_v59 = vld [vmem:[#allocation7 + $0x28] sm:$0xff] }
  0xcc   : > { %2690 = vmatprep.subr.bf16.mxu1 %v2689_v54  ;;  %v483_v60 = vld [vmem:[%s3511_s22 + $0x10] sm:$0xff]  ;;  %v2697_v61 = vpack.c.bf16 %v846_v59, %v845_v58  ;;  %v486_v62 = vld [vmem:[%s3511_s22 + $0x28] sm:$0xff]  ;;  %v485_v1 = vld [vmem:[%s3511_s22 + $0x20] sm:$0xff] }
  0xcd   : > { %2652 = vmatpush1.bf16.msra.mxu0 %v2651_v13  ;;  %2692 = vmatpush3.bf16.msra.mxu1 %v2689_v54  ;;  %v847_v63 = vld [vmem:[#allocation7 + $0x30] sm:$0xff]  ;;  %v488_v3 = vld [vmem:[%s3511_s22 + $0x38] sm:$0xff]  ;;  %v849_v4 = vld [vmem:[#allocation7 + $0x40] sm:$0xff] }
  0xce   : > { %2653 = vmatprep.subr.bf16.mxu0 %v3197_v0  ;;  %2694 = vmatprep.subr.bf16.mxu1 %v2693_v57  ;;  %v850_v5 = vld [vmem:[#allocation7 + $0x48] sm:$0xff]  ;;  %v487_v6 = vld [vmem:[%s3511_s22 + $0x30] sm:$0xff]  ;;  %v852_v10 = vld [vmem:[#allocation7 + $0x58] sm:$0xff] }
  0xcf   : > { %v2705_v7 = vpack.c.bf16 %v850_v5, %v849_v4  ;;  %v490_v8 = vld [vmem:[%s3511_s22 + $0x48] sm:$0xff]  ;;  %v851_v9 = vld [vmem:[#allocation7 + $0x50] sm:$0xff]  ;;  %v489_v11 = vld [vmem:[%s3511_s22 + $0x40] sm:$0xff] }
  0xd0   : > { %v2709_v12 = vpack.c.bf16 %v852_v10, %v851_v9  ;;  %v492_v13 = vld [vmem:[%s3511_s22 + $0x58] sm:$0xff]  ;;  %v491_v14 = vld [vmem:[%s3511_s22 + $0x50] sm:$0xff]  ;;  %v494_v15 = vld [vmem:[%s3511_s22 + $0x68] sm:$0xff] }
  0xd1   : > { %2655 = vmatpush1.bf16.msra.mxu0 %v2654_v16  ;;  %2696 = vmatpush3.bf16.msra.mxu1 %v2693_v57  ;;  %v493_v16 = vld [vmem:[%s3511_s22 + $0x60] sm:$0xff]  ;;  %v496_v17 = vld [vmem:[%s3511_s22 + $0x78] sm:$0xff]  ;;  %v495_v18 = vld [vmem:[%s3511_s22 + $0x70] sm:$0xff] }
  0xd2   : > { %2656 = vmatprep.subr.bf16.mxu0 %v3197_v0  ;;  %2698 = vmatprep.subr.bf16.mxu1 %v2697_v61  ;;  %v497_v20 = vld [vmem:[%s3511_s22 + $0x80] sm:$0xff]  ;;  %v500_v21 = vld [vmem:[%s3511_s22 + $0x98] sm:$0xff]  ;;  %v502_v23 = vld [vmem:[%s3511_s22 + $0xa8] sm:$0xff] }
  0xd3   : > { %v501_v24 = vld [vmem:[%s3511_s22 + $0xa0] sm:$0xff]  ;;  %v503_v26 = vld [vmem:[%s3511_s22 + $0xb0] sm:$0xff]  ;;  %v506_v27 = vld [vmem:[%s3511_s22 + $0xc8] sm:$0xff] }
  0xd4   : > { %v508_v29 = vld [vmem:[%s3511_s22 + $0xd8] sm:$0xff]  ;;  %v507_v30 = vld [vmem:[%s3511_s22 + $0xd0] sm:$0xff]  ;;  %v509_v32 = vld [vmem:[%s3511_s22 + $0xe0] sm:$0xff] }
  0xd5   : > { %2658 = vmatpush1.bf16.msra.mxu0 %v2657_v19  ;;  %2700 = vmatpush3.bf16.msra.mxu1 %v2697_v61  ;;  %v498_v19 = vld [vmem:[%s3511_s22 + $0x88] sm:$0xff]  ;;  %v512_v33 = vld [vmem:[%s3511_s22 + $0xf8] sm:$0xff]  ;;  %v513_v36 = vld [vmem:[%s3511_s22 + $0x100] sm:$0xff] }
  0xd6   : > { %2659 = vmatprep.subr.bf16.mxu0 %v3197_v0  ;;  %v514_v35 = vld [vmem:[%s3511_s22 + $0x108] sm:$0xff]  ;;  %v515_v38 = vld [vmem:[%s3511_s22 + $0x110] sm:$0xff]  ;;  %v520_v41 = vld [vmem:[%s3511_s22 + $0x138] sm:$0xff] }
  0xd7   : > { %v518_v39 = vld [vmem:[%s3511_s22 + $0x128] sm:$0xff]  ;;  %v519_v42 = vld [vmem:[%s3511_s22 + $0x130] sm:$0xff]  ;;  %v521_v44 = vld [vmem:[%s3511_s22 + $0x140] sm:$0xff] }
  0xd8   : > { %v524_v45 = vld [vmem:[%s3511_s22 + $0x158] sm:$0xff]  ;;  %v853_v47 = vld [vmem:[#allocation7 + $0x60] sm:$0xff]  ;;  %v854_v48 = vld [vmem:[#allocation7 + $0x68] sm:$0xff] }
  0xd9   : > { %2661 = vmatpush1.bf16.msra.mxu0 %v2660_v22  ;;  %v499_v22 = vld [vmem:[%s3511_s22 + $0x90] sm:$0xff]  ;;  %v2713_v50 = vpack.c.bf16 %v854_v48, %v853_v47  ;;  %v525_v51 = vld [vmem:[%s3511_s22 + $0x160] sm:$0xff]  ;;  %v528_v54 = vld [vmem:[%s3511_s22 + $0x178] sm:$0xff] }
  0xda   : > { %2662 = vmatprep.subr.bf16.mxu0 %v3197_v0  ;;  %v855_v52 = vld [vmem:[#allocation7 + $0x70] sm:$0xff]  ;;  %v530_v57 = vld [vmem:[%s3511_s22 + $0x188] sm:$0xff]  ;;  %v529_v58 = vld [vmem:[%s3511_s22 + $0x180] sm:$0xff] }
  0xdb   : > { %v532_v59 = vld [vmem:[%s3511_s22 + $0x198] sm:$0xff]  ;;  %v534_v61 = vld [vmem:[%s3511_s22 + $0x1a8] sm:$0xff]  ;;  %v539_v4 = vld [vmem:[%s3511_s22 + $0x1d0] sm:$0xff] }
  0xdc   : > { %v542_v5 = vld [vmem:[%s3511_s22 + $0x1e8] sm:$0xff]  ;;  %v3612_v9 = vld [vmem:[%s3882_s2] ss:$0 sm:$0xff]  ;;  %v1132_v47 = vld [vmem:[#allocation8 + $0x58] sm:$0xff] }
  0xdd   : > { %2664 = vmatpush1.bf16.msra.mxu0 %v2663_v25  ;;  %v504_v25 = vld [vmem:[%s3511_s22 + $0xb8] sm:$0xff] }
  0xde   : > { %2665 = vmatprep.subr.bf16.mxu0 %v3197_v0 }
  0xe1   : > { %2667 = vmatpush1.bf16.msra.mxu0 %v2666_v28  ;;  %v505_v28 = vld [vmem:[%s3511_s22 + $0xc0] sm:$0xff] }
  0xe2   : > { %2668 = vmatprep.subr.bf16.mxu0 %v3197_v0 }
  0xe5   : > { %2670 = vmatpush1.bf16.msra.mxu0 %v2669_v31  ;;  %v510_v31 = vld [vmem:[%s3511_s22 + $0xe8] sm:$0xff] }
  0xe6   : > { %2671 = vmatprep.subr.bf16.mxu0 %v3197_v0 }
  0xe9   : > { %2673 = vmatpush1.bf16.msra.mxu0 %v2672_v34  ;;  %v511_v34 = vld [vmem:[%s3511_s22 + $0xf0] sm:$0xff] }
  0xea   : > { %2674 = vmatprep.subr.bf16.mxu0 %v3197_v0 }
  0xed   : > { %2676 = vmatpush1.bf16.msra.mxu0 %v2675_v37  ;;  %v516_v37 = vld [vmem:[%s3511_s22 + $0x118] sm:$0xff] }
  0xee   : > { %2677 = vmatprep.subr.bf16.mxu0 %v3197_v0 }
  0xf1   : > { %2679 = vmatpush1.bf16.msra.mxu0 %v2678_v40  ;;  %v517_v40 = vld [vmem:[%s3511_s22 + $0x120] sm:$0xff] }
  0xf2   : > { %2680 = vmatprep.subr.bf16.mxu0 %v3197_v0 }
  0xf5   : > { %2682 = vmatpush1.bf16.msra.mxu0 %v2681_v43  ;;  %v522_v43 = vld [vmem:[%s3511_s22 + $0x148] sm:$0xff] }
  0xf6   : > { %2683 = vmatprep.subr.bf16.mxu0 %v3197_v0 }
  0xf9   : > { %2685 = vmatpush1.bf16.msra.mxu0 %v2684_v46  ;;  %v523_v46 = vld [vmem:[%s3511_s22 + $0x150] sm:$0xff] }
  0xfa   : > { %2686 = vmatprep.subr.bf16.mxu0 %v3197_v0  ;;  %v848_v0 = vld [vmem:[#allocation7 + $0x38] sm:$0xff] }
  0xfb   : > { %v2701_v2 = vpack.c.bf16 %v848_v0, %v847_v63  ;;  %v536_v63 = vld [vmem:[%s3511_s22 + $0x1b8] sm:$0xff]  ;;  %v535_v0 = vld [vmem:[%s3511_s22 + $0x1b0] sm:$0xff] }
  0xfd   : > { %2688 = vmatpush1.bf16.msra.mxu0 %v2687_v49  ;;  %2702 = vmatprep.subr.bf16.mxu1 %v2701_v2  ;;  %v526_v49 = vld [vmem:[%s3511_s22 + $0x168] sm:$0xff] }
  0xfe   : > { %2704 = vmatpush3.bf16.msra.mxu1 %v2701_v2  ;;  %v537_v2 = vld [vmem:[%s3511_s22 + $0x1c0] sm:$0xff] }
  0xff   : > { %2706 = vmatprep.subr.bf16.mxu1 %v2705_v7 }
 0x100   : > { %649 = vmatmul.mubr.f32.vlgmr.msra.gmra.mrb[0].mxu0 %v481_v53  ;;  %v856_v53 = vld [vmem:[#allocation7 + $0x78] sm:$0xff] }
 0x101   : > { %653 = vmatprep.mubr.f32.mxu0 %v484_v56  ;;  %v2717_v55 = vpack.c.bf16 %v856_v53, %v855_v52  ;;  %v527_v56 = vld [vmem:[%s3511_s22 + $0x170] sm:$0xff]  ;;  %v1133_v53 = vld [vmem:[#allocation8 + $0x60] sm:$0xff] }
 0x102   : > { %2708 = vmatpush3.bf16.msra.mxu1 %v2705_v7  ;;  %v544_v7 = vld [vmem:[%s3511_s22 + $0x1f8] sm:$0xff] }
 0x103   : > { %2710 = vmatprep.subr.bf16.mxu1 %v2709_v12 }
 0x104   : > { %654 = vmatmul.mubr.f32.gmra.mrb[2].mxu0 %v483_v60  ;;  %v531_v60 = vld [vmem:[%s3511_s22 + $0x190] sm:$0xff] }
 0x105   : > { %658 = vmatprep.mubr.f32.mxu0 %v486_v62  ;;  %v533_v62 = vld [vmem:[%s3511_s22 + $0x1a0] sm:$0xff] }
 0x106   : > { %2712 = vmatpush3.bf16.msra.mxu1 %v2709_v12 }
 0x107   : > { %2714 = vmatprep.subr.bf16.mxu1 %v2713_v50 }
 0x108   : > { %659 = vmatmul.mubr.f32.gmra.mrb[4].mxu0 %v485_v1  ;;  %v538_v1 = vld [vmem:[%s3511_s22 + $0x1c8] sm:$0xff] }
 0x109   : > { %663 = vmatprep.mubr.f32.mxu0 %v488_v3  ;;  %v540_v3 = vld [vmem:[%s3511_s22 + $0x1d8] sm:$0xff] }
 0x10a   : > { %2716 = vmatpush3.bf16.msra.mxu1 %v2713_v50 }
 0x10b   : > { %2718 = vmatprep.subr.bf16.mxu1 %v2717_v55 }
 0x10c   : > { %664 = vmatmul.mubr.f32.gmra.mrb[6].mxu0 %v487_v6  ;;  %v541_v6 = vld [vmem:[%s3511_s22 + $0x1e0] sm:$0xff] }
 0x10d   : > { %668 = vmatprep.mubr.f32.mxu0 %v490_v8  ;;  %v543_v8 = vld [vmem:[%s3511_s22 + $0x1f0] sm:$0xff]  ;;  %s3917_s22 = sld [smem:[#allocation21_spill]] }
 0x10e   : > { %2720 = vmatpush3.bf16.msra.mxu1 %v2717_v55 }
 0x110   : > { %669 = vmatmul.mubr.f32.gmra.mrb[8].mxu0 %v489_v11 }
 0x111   : > { %673 = vmatprep.mubr.f32.mxu0 %v492_v13  ;;  %v1121_v13 = vld [vmem:[#allocation8] sm:$0xff] }
 0x114   : > { %674 = vmatmul.mubr.f32.gmra.mrb[10].mxu0 %v491_v14  ;;  %v1122_v14 = vld [vmem:[#allocation8 + $0x8] sm:$0xff] }
 0x115   : > { %678 = vmatprep.mubr.f32.mxu0 %v494_v15  ;;  %v2721_v15 = vpack.c.bf16 %v1122_v14, %v1121_v13 }
 0x117   : > { %2722 = vmatprep.subr.bf16.mxu1 %v2721_v15 }
 0x118   : > { %679 = vmatmul.mubr.f32.gmra.mrb[12].mxu0 %v493_v16 }
 0x119   : > { %683 = vmatprep.mubr.f32.mxu0 %v496_v17 }
 0x11c   : > { %684 = vmatmul.mubr.f32.gmra.mrb[14].mxu0 %v495_v18  ;;  %v1123_v18 = vld [vmem:[#allocation8 + $0x10] sm:$0xff] }
 0x11d   : > { %688 = vmatprep.mubr.f32.mxu0 %v498_v19  ;;  %v1124_v19 = vld [vmem:[#allocation8 + $0x18] sm:$0xff] }
 0x120   : > { %689 = vmatmul.mubr.f32.gmra.mrb[16].mxu0 %v497_v20 }
 0x121   : > { %693 = vmatprep.mubr.f32.mxu0 %v500_v21 }
 0x124   : > { %694 = vmatmul.mubr.f32.gmra.mrb[18].mxu0 %v499_v22 }
 0x125   : > { %698 = vmatprep.mubr.f32.mxu0 %v502_v23  ;;  %v2725_v23 = vpack.c.bf16 %v1124_v19, %v1123_v18 }
 0x128   : > { %699 = vmatmul.mubr.f32.gmra.mrb[20].mxu0 %v501_v24 }
 0x129   : > { %703 = vmatprep.mubr.f32.mxu0 %v504_v25  ;;  %v1125_v25 = vld [vmem:[#allocation8 + $0x20] sm:$0xff] }
 0x12c   : > { %704 = vmatmul.mubr.f32.gmra.mrb[22].mxu0 %v503_v26  ;;  %v1126_v26 = vld [vmem:[#allocation8 + $0x28] sm:$0xff] }
 0x12d   : > { %708 = vmatprep.mubr.f32.mxu0 %v506_v27 }
 0x130   : > { %709 = vmatmul.mubr.f32.gmra.mrb[24].mxu0 %v505_v28 }
 0x131   : > { %713 = vmatprep.mubr.f32.mxu0 %v508_v29 }
 0x134   : > { %714 = vmatmul.mubr.f32.gmra.mrb[26].mxu0 %v507_v30  ;;  %v2729_v30 = vpack.c.bf16 %v1126_v26, %v1125_v25 }
 0x135   : > { %718 = vmatprep.mubr.f32.mxu0 %v510_v31 }
 0x138   : > { %719 = vmatmul.mubr.f32.gmra.mrb[28].mxu0 %v509_v32  ;;  %v1127_v32 = vld [vmem:[#allocation8 + $0x30] sm:$0xff] }
 0x139   : > { %723 = vmatprep.mubr.f32.mxu0 %v512_v33  ;;  %v1128_v33 = vld [vmem:[#allocation8 + $0x38] sm:$0xff] }
 0x13c   : > { %724 = vmatmul.mubr.f32.gmra.mrb[30].mxu0 %v511_v34 }
 0x13d   : > { %728 = vmatprep.mubr.f32.mxu0 %v514_v35 }
 0x140   : > { %729 = vmatmul.mubr.f32.gmra.mrb[32].mxu0 %v513_v36 }
 0x141   : > { %733 = vmatprep.mubr.f32.mxu0 %v516_v37  ;;  %v2733_v37 = vpack.c.bf16 %v1128_v33, %v1127_v32 }
 0x144   : > { %734 = vmatmul.mubr.f32.gmra.mrb[34].mxu0 %v515_v38 }
 0x145   : > { %738 = vmatprep.mubr.f32.mxu0 %v518_v39  ;;  %v1129_v39 = vld [vmem:[#allocation8 + $0x40] sm:$0xff] }
 0x148   : > { %739 = vmatmul.mubr.f32.gmra.mrb[36].mxu0 %v517_v40  ;;  %v1130_v40 = vld [vmem:[#allocation8 + $0x48] sm:$0xff] }
 0x149   : > { %743 = vmatprep.mubr.f32.mxu0 %v520_v41 }
 0x14c   : > { %744 = vmatmul.mubr.f32.gmra.mrb[38].mxu0 %v519_v42 }
 0x14d   : > { %748 = vmatprep.mubr.f32.mxu0 %v522_v43 }
 0x150   : > { %749 = vmatmul.mubr.f32.gmra.mrb[40].mxu0 %v521_v44  ;;  %v2737_v44 = vpack.c.bf16 %v1130_v40, %v1129_v39 }
 0x151   : > { %753 = vmatprep.mubr.f32.mxu0 %v524_v45 }
 0x154   : > { %754 = vmatmul.mubr.f32.gmra.mrb[42].mxu0 %v523_v46  ;;  %v1131_v46 = vld [vmem:[#allocation8 + $0x50] sm:$0xff] }
 0x155   : > { %758 = vmatprep.mubr.f32.mxu0 %v526_v49 }
 0x158   : > { %759 = vmatmul.mubr.f32.gmra.mrb[44].mxu0 %v525_v51  ;;  %v2741_v51 = vpack.c.bf16 %v1132_v47, %v1131_v46 }
 0x159   : > { %763 = vmatprep.mubr.f32.mxu0 %v528_v54  ;;  %v1134_v54 = vld [vmem:[#allocation8 + $0x68] sm:$0xff] }
 0x15c   : > { %764 = vmatmul.mubr.f32.gmra.mrb[46].mxu0 %v527_v56 }
 0x15d   : > { %768 = vmatprep.mubr.f32.mxu0 %v530_v57 }
 0x160   : > { %769 = vmatmul.mubr.f32.gmra.mrb[48].mxu0 %v529_v58  ;;  %v2745_v58 = vpack.c.bf16 %v1134_v54, %v1133_v53 }
 0x161   : > { %773 = vmatprep.mubr.f32.mxu0 %v532_v59 }
 0x164   : > { %774 = vmatmul.mubr.f32.gmra.mrb[50].mxu0 %v531_v60 }
 0x165   : > { %778 = vmatprep.mubr.f32.mxu0 %v534_v61 }
 0x168   : > { %779 = vmatmul.mubr.f32.gmra.mrb[52].mxu0 %v533_v62 }
 0x169   : > { %783 = vmatprep.mubr.f32.mxu0 %v536_v63 }
 0x16c   : > { %784 = vmatmul.mubr.f32.gmra.mrb[54].mxu0 %v535_v0 }
 0x16d   : > { %788 = vmatprep.mubr.f32.mxu0 %v538_v1 }
 0x170   : > { %789 = vmatmul.mubr.f32.gmra.mrb[56].mxu0 %v537_v2 }
 0x171   : > { %793 = vmatprep.mubr.f32.mxu0 %v540_v3 }
 0x174   : > { %794 = vmatmul.mubr.f32.gmra.mrb[58].mxu0 %v539_v4 }
 0x175   : > { %798 = vmatprep.mubr.f32.mxu0 %v542_v5 }
 0x178   : > { %799 = vmatmul.mubr.f32.gmra.mrb[60].mxu0 %v541_v6 }
 0x179   : > { %803 = vmatprep.mubr.f32.mxu0 %v544_v7 }
 0x17c   : > { %804 = vmatmul.mubr.f32.gmra.mrb[62].mxu0 %v543_v8 }
 0x1d3   : > { %v650_v10 = vpop.f32.mrb[0].mxu0 }
 0x1d4   : > { %v652_v11 = vpop.f32.mrb[1].mxu0  ;;  %v651_v12 = vadd.f32 %v3612_v9, %v650_v10 }
 0x1d6   : > { %v809_v16 = vmax.f32 %v651_v12, 0.0 }
 0x1d7   : > { %v655_v17 = vpop.f32.mrb[2].mxu0 }
 0x1d8   : > { %v656_v20 = vadd.f32 %v3612_v9, %v655_v17  ;;  %v657_v21 = vpop.f32.mrb[3].mxu0  ;;  %2353 = vmatprep.mubr.f32.mxu1 %v809_v16 }
 0x1da   : > { %v810_v22 = vmax.f32 %v656_v20, 0.0 }
 0x1db   : > { %v660_v24 = vpop.f32.mrb[4].mxu0 }
 0x1dc   : > { %v661_v27 = vadd.f32 %v3612_v9, %v660_v24  ;;  %v662_v28 = vpop.f32.mrb[5].mxu0  ;;  %2354 = vmatmul.mubr.f32.vlgmr.msra.gmra.mrb[0].mxu1 %v810_v22 }
 0x1dd   : > { %2724 = vmatpush3.bf16.msra.mxu1 %v2721_v15 }
 0x1de   : > { %v811_v29 = vmax.f32 %v661_v27, 0.0  ;;  %2726 = vmatprep.subr.bf16.mxu1 %v2725_v23 }
 0x1df   : > { %v665_v31 = vpop.f32.mrb[6].mxu0 }
 0x1e0   : > { %v666_v34 = vadd.f32 %v3612_v9, %v665_v31  ;;  %v667_v35 = vpop.f32.mrb[7].mxu0  ;;  %2356 = vmatprep.mubr.f32.mxu1 %v811_v29 }
 0x1e1   : > { %2728 = vmatpush3.bf16.msra.mxu1 %v2725_v23 }
 0x1e2   : > { %v812_v36 = vmax.f32 %v666_v34, 0.0  ;;  %2730 = vmatprep.subr.bf16.mxu1 %v2729_v30 }
 0x1e3   : > { %v670_v38 = vpop.f32.mrb[8].mxu0 }
 0x1e4   : > { %v671_v41 = vadd.f32 %v3612_v9, %v670_v38  ;;  %v672_v42 = vpop.f32.mrb[9].mxu0  ;;  %2357 = vmatmul.mubr.f32.gmra.mrb[2].mxu1 %v812_v36 }
 0x1e5   : > { %2732 = vmatpush3.bf16.msra.mxu1 %v2729_v30 }
 0x1e6   : > { %v813_v43 = vmax.f32 %v671_v41, 0.0  ;;  %2734 = vmatprep.subr.bf16.mxu1 %v2733_v37 }
 0x1e7   : > { %v675_v45 = vpop.f32.mrb[10].mxu0 }
 0x1e8   : > { %v676_v48 = vadd.f32 %v3612_v9, %v675_v45  ;;  %v677_v49 = vpop.f32.mrb[11].mxu0  ;;  %2359 = vmatprep.mubr.f32.mxu1 %v813_v43 }
 0x1e9   : > { %2736 = vmatpush3.bf16.msra.mxu1 %v2733_v37 }
 0x1ea   : > { %v814_v50 = vmax.f32 %v676_v48, 0.0  ;;  %2738 = vmatprep.subr.bf16.mxu1 %v2737_v44 }
 0x1eb   : > { %v680_v52 = vpop.f32.mrb[12].mxu0 }
 0x1ec   : > { %v681_v55 = vadd.f32 %v3612_v9, %v680_v52  ;;  %v682_v56 = vpop.f32.mrb[13].mxu0  ;;  %2360 = vmatmul.mubr.f32.gmra.mrb[4].mxu1 %v814_v50 }
 0x1ed   : > { %2740 = vmatpush3.bf16.msra.mxu1 %v2737_v44 }
 0x1ee   : > { %v815_v57 = vmax.f32 %v681_v55, 0.0  ;;  %2742 = vmatprep.subr.bf16.mxu1 %v2741_v51 }
 0x1ef   : > { %v685_v59 = vpop.f32.mrb[14].mxu0 }
 0x1f0   : > { %v686_v60 = vadd.f32 %v3612_v9, %v685_v59  ;;  %v687_v61 = vpop.f32.mrb[15].mxu0  ;;  %2362 = vmatprep.mubr.f32.mxu1 %v815_v57 }
 0x1f1   : > { %2744 = vmatpush3.bf16.msra.mxu1 %v2741_v51  ;;  %v1135_v61 = vld [vmem:[#allocation8 + $0x70] sm:$0xff] }
 0x1f2   : > { %v816_v62 = vmax.f32 %v686_v60, 0.0  ;;  %2746 = vmatprep.subr.bf16.mxu1 %v2745_v58 }
 0x1f3   : > { %v690_v63 = vpop.f32.mrb[16].mxu0 }
 0x1f4   : > { %v691_v0 = vadd.f32 %v3612_v9, %v690_v63  ;;  %v692_v1 = vpop.f32.mrb[17].mxu0  ;;  %2363 = vmatmul.mubr.f32.gmra.mrb[6].mxu1 %v816_v62  ;;  %v1136_v62 = vld [vmem:[#allocation8 + $0x78] sm:$0xff] }
 0x1f5   : > { %2748 = vmatpush3.bf16.msra.mxu1 %v2745_v58  ;;  %v2749_v1 = vpack.c.bf16 %v1136_v62, %v1135_v61  ;;  %v1410_v61 = vld [vmem:[#allocation10 + $0x48] sm:$0xff] }
 0x1f6   : > { %v817_v2 = vmax.f32 %v691_v0, 0.0 }
 0x1f7   : > { %v695_v3 = vpop.f32.mrb[18].mxu0  ;;  %2750 = vmatprep.subr.bf16.mxu1 %v2749_v1 }
 0x1f8   : > { %v696_v4 = vadd.f32 %v3612_v9, %v695_v3  ;;  %v697_v5 = vpop.f32.mrb[19].mxu0  ;;  %2365 = vmatprep.mubr.f32.mxu1 %v817_v2 }
 0x1f9   : > { %2752 = vmatpush3.bf16.msra.mxu1 %v2749_v1 }
 0x1fa   : > { %v818_v6 = vmax.f32 %v696_v4, 0.0 }
 0x1fb   : > { %v700_v7 = vpop.f32.mrb[20].mxu0 }
 0x1fc   : > { %v701_v8 = vadd.f32 %v3612_v9, %v700_v7  ;;  %v702_v10 = vpop.f32.mrb[21].mxu0  ;;  %2366 = vmatmul.mubr.f32.gmra.mrb[8].mxu1 %v818_v6 }
 0x1fe   : > { %v819_v11 = vmax.f32 %v701_v8, 0.0 }
 0x1ff   : > { %v705_v12 = vpop.f32.mrb[22].mxu0 }
 0x200   : > { %v706_v13 = vadd.f32 %v3612_v9, %v705_v12  ;;  %v707_v14 = vpop.f32.mrb[23].mxu0  ;;  %2368 = vmatprep.mubr.f32.mxu1 %v819_v11 }
 0x202   : > { %v820_v15 = vmax.f32 %v706_v13, 0.0 }
 0x203   : > { %v710_v16 = vpop.f32.mrb[24].mxu0 }
 0x204   : > { %v711_v17 = vadd.f32 %v3612_v9, %v710_v16  ;;  %v712_v18 = vpop.f32.mrb[25].mxu0  ;;  %2369 = vmatmul.mubr.f32.gmra.mrb[10].mxu1 %v820_v15 }
 0x206   : > { %v821_v19 = vmax.f32 %v711_v17, 0.0 }
 0x207   : > { %v715_v20 = vpop.f32.mrb[26].mxu0 }
 0x208   : > { %v716_v21 = vadd.f32 %v3612_v9, %v715_v20  ;;  %v717_v22 = vpop.f32.mrb[27].mxu0  ;;  %2371 = vmatprep.mubr.f32.mxu1 %v821_v19 }
 0x20a   : > { %v822_v23 = vmax.f32 %v716_v21, 0.0 }
 0x20b   : > { %v720_v24 = vpop.f32.mrb[28].mxu0 }
 0x20c   : > { %v721_v25 = vadd.f32 %v3612_v9, %v720_v24  ;;  %v722_v26 = vpop.f32.mrb[29].mxu0  ;;  %2372 = vmatmul.mubr.f32.gmra.mrb[12].mxu1 %v822_v23 }
 0x20e   : > { %v823_v27 = vmax.f32 %v721_v25, 0.0 }
 0x20f   : > { %v725_v28 = vpop.f32.mrb[30].mxu0 }
 0x210   : > { %v726_v29 = vadd.f32 %v3612_v9, %v725_v28  ;;  %v727_v30 = vpop.f32.mrb[31].mxu0  ;;  %2374 = vmatprep.mubr.f32.mxu1 %v823_v27 }
 0x212   : > { %v824_v31 = vmax.f32 %v726_v29, 0.0 }
 0x213   : > { %v730_v32 = vpop.f32.mrb[32].mxu0 }
 0x214   : > { %v731_v33 = vadd.f32 %v3612_v9, %v730_v32  ;;  %v732_v34 = vpop.f32.mrb[33].mxu0  ;;  %2375 = vmatmul.mubr.f32.gmra.mrb[14].mxu1 %v824_v31 }
 0x216   : > { %v825_v35 = vmax.f32 %v731_v33, 0.0 }
 0x217   : > { %v735_v36 = vpop.f32.mrb[34].mxu0 }
 0x218   : > { %v736_v37 = vadd.f32 %v3612_v9, %v735_v36  ;;  %v737_v38 = vpop.f32.mrb[35].mxu0  ;;  %2377 = vmatprep.mubr.f32.mxu1 %v825_v35  ;;  %v3649_v36 = vld [vmem:[%s3884_s4] ss:$0 sm:$0xff] }
 0x219   : > { %v1402_v38 = vld [vmem:[#allocation10 + $0x8] sm:$0xff] }
 0x21a   : > { %v826_v39 = vmax.f32 %v736_v37, 0.0  ;;  %v1401_v37 = vld [vmem:[#allocation10] sm:$0xff] }
 0x21b   : > { %v740_v40 = vpop.f32.mrb[36].mxu0 }
 0x21c   : > { %v741_v41 = vadd.f32 %v3612_v9, %v740_v40  ;;  %v742_v42 = vpop.f32.mrb[37].mxu0  ;;  %2378 = vmatmul.mubr.f32.gmra.mrb[16].mxu1 %v826_v39  ;;  %v2753_v40 = vpack.c.bf16 %v1402_v38, %v1401_v37 }
 0x21e   : > { %v827_v43 = vmax.f32 %v741_v41, 0.0  ;;  %2754 = vmatprep.subr.bf16.mxu1 %v2753_v40 }
 0x21f   : > { %v745_v44 = vpop.f32.mrb[38].mxu0 }
 0x220   : > { %v746_v45 = vadd.f32 %v3612_v9, %v745_v44  ;;  %v747_v46 = vpop.f32.mrb[39].mxu0  ;;  %2380 = vmatprep.mubr.f32.mxu1 %v827_v43  ;;  %v1404_v44 = vld [vmem:[#allocation10 + $0x18] sm:$0xff] }
 0x222   : > { %v828_v47 = vmax.f32 %v746_v45, 0.0 }
 0x223   : > { %v750_v48 = vpop.f32.mrb[40].mxu0 }
 0x224   : > { %v751_v49 = vadd.f32 %v3612_v9, %v750_v48  ;;  %v752_v50 = vpop.f32.mrb[41].mxu0  ;;  %2381 = vmatmul.mubr.f32.gmra.mrb[18].mxu1 %v828_v47  ;;  %v1405_v48 = vld [vmem:[#allocation10 + $0x20] sm:$0xff] }
 0x226   : > { %v829_v51 = vmax.f32 %v751_v49, 0.0  ;;  %v1406_v49 = vld [vmem:[#allocation10 + $0x28] sm:$0xff] }
 0x227   : > { %v755_v52 = vpop.f32.mrb[42].mxu0 }
 0x228   : > { %v756_v53 = vadd.f32 %v3612_v9, %v755_v52  ;;  %v757_v54 = vpop.f32.mrb[43].mxu0  ;;  %2383 = vmatprep.mubr.f32.mxu1 %v829_v51 }
 0x22a   : > { %v830_v55 = vmax.f32 %v756_v53, 0.0  ;;  %v2761_v53 = vpack.c.bf16 %v1406_v49, %v1405_v48 }
 0x22b   : > { %v760_v56 = vpop.f32.mrb[44].mxu0 }
 0x22c   : > { %v761_v57 = vadd.f32 %v3612_v9, %v760_v56  ;;  %v762_v58 = vpop.f32.mrb[45].mxu0  ;;  %2384 = vmatmul.mubr.f32.gmra.mrb[20].mxu1 %v830_v55  ;;  %v1407_v55 = vld [vmem:[#allocation10 + $0x30] sm:$0xff]  ;;  %v1408_v56 = vld [vmem:[#allocation10 + $0x38] sm:$0xff] }
 0x22e   : > { %v831_v59 = vmax.f32 %v761_v57, 0.0 }
 0x22f   : > { %v765_v60 = vpop.f32.mrb[46].mxu0 }
 0x230   : > { %v766_v63 = vadd.f32 %v3612_v9, %v765_v60  ;;  %v767_v0 = vpop.f32.mrb[47].mxu0  ;;  %2386 = vmatprep.mubr.f32.mxu1 %v831_v59  ;;  %v2765_v59 = vpack.c.bf16 %v1408_v56, %v1407_v55  ;;  %v1409_v60 = vld [vmem:[#allocation10 + $0x40] sm:$0xff] }
 0x231   : > { %v2769_v1 = vpack.c.bf16 %v1410_v61, %v1409_v60 }
 0x232   : > { %v832_v2 = vmax.f32 %v766_v63, 0.0 }
 0x233   : > { %v770_v3 = vpop.f32.mrb[48].mxu0 }
 0x234   : > { %v771_v4 = vadd.f32 %v3612_v9, %v770_v3  ;;  %v772_v5 = vpop.f32.mrb[49].mxu0  ;;  %2387 = vmatmul.mubr.f32.gmra.mrb[22].mxu1 %v832_v2  ;;  %v1411_v3 = vld [vmem:[#allocation10 + $0x50] sm:$0xff] }
 0x236   : > { %v833_v6 = vmax.f32 %v771_v4, 0.0  ;;  %v1412_v4 = vld [vmem:[#allocation10 + $0x58] sm:$0xff] }
 0x237   : > { %v775_v7 = vpop.f32.mrb[50].mxu0 }
 0x238   : > { %v776_v8 = vadd.f32 %v3612_v9, %v775_v7  ;;  %v777_v10 = vpop.f32.mrb[51].mxu0  ;;  %2389 = vmatprep.mubr.f32.mxu1 %v833_v6  ;;  %v2773_v7 = vpack.c.bf16 %v1412_v4, %v1411_v3 }
 0x239   : > { %v1414_v10 = vld [vmem:[#allocation10 + $0x68] sm:$0xff] }
 0x23a   : > { %v834_v11 = vmax.f32 %v776_v8, 0.0  ;;  %v1413_v8 = vld [vmem:[#allocation10 + $0x60] sm:$0xff] }
 0x23b   : > { %v780_v12 = vpop.f32.mrb[52].mxu0 }
 0x23c   : > { %v781_v13 = vadd.f32 %v3612_v9, %v780_v12  ;;  %v782_v14 = vpop.f32.mrb[53].mxu0  ;;  %2390 = vmatmul.mubr.f32.gmra.mrb[24].mxu1 %v834_v11 }
 0x23d   : > { %v2777_v14 = vpack.c.bf16 %v1414_v10, %v1413_v8 }
 0x23e   : > { %v835_v15 = vmax.f32 %v781_v13, 0.0 }
 0x23f   : > { %v785_v16 = vpop.f32.mrb[54].mxu0 }
 0x240   : > { %v786_v17 = vadd.f32 %v3612_v9, %v785_v16  ;;  %v787_v18 = vpop.f32.mrb[55].mxu0  ;;  %2392 = vmatprep.mubr.f32.mxu1 %v835_v15 }
 0x242   : > { %v836_v19 = vmax.f32 %v786_v17, 0.0 }
 0x243   : > { %v790_v20 = vpop.f32.mrb[56].mxu0 }
 0x244   : > { %v791_v21 = vadd.f32 %v3612_v9, %v790_v20  ;;  %v792_v22 = vpop.f32.mrb[57].mxu0  ;;  %2393 = vmatmul.mubr.f32.gmra.mrb[26].mxu1 %v836_v19 }
 0x246   : > { %v837_v23 = vmax.f32 %v791_v21, 0.0 }
 0x247   : > { %v795_v24 = vpop.f32.mrb[58].mxu0 }
 0x248   : > { %v796_v25 = vadd.f32 %v3612_v9, %v795_v24  ;;  %v797_v26 = vpop.f32.mrb[59].mxu0  ;;  %2395 = vmatprep.mubr.f32.mxu1 %v837_v23 }
 0x24a   : > { %v838_v27 = vmax.f32 %v796_v25, 0.0 }
 0x24b   : > { %v800_v28 = vpop.f32.mrb[60].mxu0 }
 0x24c   : > { %v801_v29 = vadd.f32 %v3612_v9, %v800_v28  ;;  %v802_v30 = vpop.f32.mrb[61].mxu0  ;;  %2396 = vmatmul.mubr.f32.gmra.mrb[28].mxu1 %v838_v27 }
 0x24e   : > { %v839_v31 = vmax.f32 %v801_v29, 0.0 }
 0x24f   : > { %v805_v32 = vpop.f32.mrb[62].mxu0 }
 0x250   : > { %v806_v33 = vadd.f32 %v3612_v9, %v805_v32  ;;  %v807_v34 = vpop.f32.mrb[63].mxu0  ;;  %2398 = vmatprep.mubr.f32.mxu1 %v839_v31  ;;  %v1403_v9 = vld [vmem:[#allocation10 + $0x10] sm:$0xff] }
 0x251   : > { %v2757_v47 = vpack.c.bf16 %v1404_v44, %v1403_v9 }
 0x252   : > { %v840_v35 = vmax.f32 %v806_v33, 0.0 }
 0x254   : > { %2399 = vmatmul.mubr.f32.gmra.mrb[30].mxu1 %v840_v35 }
 0x2af   : > { %v2355_v39 = vpop.f32.mrb[0].mxu1 }
 0x2b0   : > { %v936_v41 = vadd.f32 %v2355_v39, %v3649_v36  ;;  %v930_v42 = vpop.f32.mrb[1].mxu1 }
 0x2b1   : > { %v931_v43 = vadd.f32 %v3649_v36, %v930_v42 }
 0x2b2   : > { %v1090_v46 = vmax.f32 %v936_v41, 0.0 }
 0x2b3   : > { %v1089_v45 = vmax.f32 %v931_v43, 0.0 }
 0x2b5   : > { %2433 = vmatprep.mubr.f32.mxu1 %v1089_v45 }
 0x2b6   : > { %2434 = vmatmul.mubr.f32.vlgmr.msra.gmra.mrb[32].mxu1 %v1090_v46 }
 0x2b7   : > { %v2358_v50 = vpop.f32.mrb[2].mxu1  ;;  %2756 = vmatpush3.bf16.msra.mxu1 %v2753_v40 }
 0x2b8   : > { %v946_v51 = vadd.f32 %v2358_v50, %v3649_v36  ;;  %v940_v52 = vpop.f32.mrb[3].mxu1  ;;  %2758 = vmatprep.subr.bf16.mxu1 %v2757_v47 }
 0x2b9   : > { %v941_v54 = vadd.f32 %v3649_v36, %v940_v52 }
 0x2ba   : > { %v1092_v58 = vmax.f32 %v946_v51, 0.0 }
 0x2bb   : > { %v1091_v57 = vmax.f32 %v941_v54, 0.0  ;;  %2760 = vmatpush3.bf16.msra.mxu1 %v2757_v47 }
 0x2bc   : > { %2762 = vmatprep.subr.bf16.mxu1 %v2761_v53 }
 0x2bd   : > { %2436 = vmatprep.mubr.f32.mxu1 %v1091_v57 }
 0x2be   : > { %2437 = vmatmul.mubr.f32.gmra.mrb[34].mxu1 %v1092_v58 }
 0x2bf   : > { %v2361_v62 = vpop.f32.mrb[4].mxu1  ;;  %2764 = vmatpush3.bf16.msra.mxu1 %v2761_v53 }
 0x2c0   : > { %v956_v63 = vadd.f32 %v2361_v62, %v3649_v36  ;;  %v950_v0 = vpop.f32.mrb[5].mxu1  ;;  %2766 = vmatprep.subr.bf16.mxu1 %v2765_v59 }
 0x2c1   : > { %v951_v2 = vadd.f32 %v3649_v36, %v950_v0  ;;  %v1415_v0 = vld [vmem:[#allocation10 + $0x70] sm:$0xff] }
 0x2c2   : > { %v1094_v6 = vmax.f32 %v956_v63, 0.0 }
 0x2c3   : > { %v1093_v5 = vmax.f32 %v951_v2, 0.0  ;;  %2768 = vmatpush3.bf16.msra.mxu1 %v2765_v59 }
 0x2c4   : > { %2770 = vmatprep.subr.bf16.mxu1 %v2769_v1 }
 0x2c5   : > { %2439 = vmatprep.mubr.f32.mxu1 %v1093_v5 }
 0x2c6   : > { %2440 = vmatmul.mubr.f32.gmra.mrb[36].mxu1 %v1094_v6 }
 0x2c7   : > { %v2364_v11 = vpop.f32.mrb[6].mxu1  ;;  %2772 = vmatpush3.bf16.msra.mxu1 %v2769_v1  ;;  %v1416_v1 = vld [vmem:[#allocation10 + $0x78] sm:$0xff] }
 0x2c8   : > { %v966_v12 = vadd.f32 %v2364_v11, %v3649_v36  ;;  %v960_v13 = vpop.f32.mrb[7].mxu1  ;;  %2774 = vmatprep.subr.bf16.mxu1 %v2773_v7  ;;  %v2781_v2 = vpack.c.bf16 %v1416_v1, %v1415_v0  ;;  %v1694_v0 = vld [vmem:[#allocation11 + $0x68] sm:$0xff] }
 0x2c9   : > { %v961_v15 = vadd.f32 %v3649_v36, %v960_v13 }
 0x2ca   : > { %v1096_v17 = vmax.f32 %v966_v12, 0.0 }
 0x2cb   : > { %v1095_v16 = vmax.f32 %v961_v15, 0.0  ;;  %2776 = vmatpush3.bf16.msra.mxu1 %v2773_v7 }
 0x2cc   : > { %2778 = vmatprep.subr.bf16.mxu1 %v2777_v14 }
 0x2cd   : > { %2442 = vmatprep.mubr.f32.mxu1 %v1095_v16 }
 0x2ce   : > { %2443 = vmatmul.mubr.f32.gmra.mrb[38].mxu1 %v1096_v17 }
 0x2cf   : > { %v2367_v18 = vpop.f32.mrb[8].mxu1  ;;  %2780 = vmatpush3.bf16.msra.mxu1 %v2777_v14 }
 0x2d0   : > { %v976_v19 = vadd.f32 %v2367_v18, %v3649_v36  ;;  %v970_v20 = vpop.f32.mrb[9].mxu1  ;;  %2782 = vmatprep.subr.bf16.mxu1 %v2781_v2 }
 0x2d1   : > { %v971_v21 = vadd.f32 %v3649_v36, %v970_v20 }
 0x2d2   : > { %v1098_v23 = vmax.f32 %v976_v19, 0.0 }
 0x2d3   : > { %v1097_v22 = vmax.f32 %v971_v21, 0.0  ;;  %2784 = vmatpush3.bf16.msra.mxu1 %v2781_v2 }
 0x2d5   : > { %2445 = vmatprep.mubr.f32.mxu1 %v1097_v22 }
 0x2d6   : > { %2446 = vmatmul.mubr.f32.gmra.mrb[40].mxu1 %v1098_v23 }
 0x2d7   : > { %v2370_v24 = vpop.f32.mrb[10].mxu1 }
 0x2d8   : > { %v986_v25 = vadd.f32 %v2370_v24, %v3649_v36  ;;  %v980_v26 = vpop.f32.mrb[11].mxu1 }
 0x2d9   : > { %v981_v27 = vadd.f32 %v3649_v36, %v980_v26 }
 0x2da   : > { %v1100_v29 = vmax.f32 %v986_v25, 0.0 }
 0x2db   : > { %v1099_v28 = vmax.f32 %v981_v27, 0.0 }
 0x2dd   : > { %2448 = vmatprep.mubr.f32.mxu1 %v1099_v28 }
 0x2de   : > { %2449 = vmatmul.mubr.f32.gmra.mrb[42].mxu1 %v1100_v29 }
 0x2df   : > { %v2373_v30 = vpop.f32.mrb[12].mxu1 }
 0x2e0   : > { %v996_v31 = vadd.f32 %v2373_v30, %v3649_v36  ;;  %v990_v32 = vpop.f32.mrb[13].mxu1  ;;  %v3686_v30 = vld [vmem:[%s3886_s6] ss:$0 sm:$0xff] }
 0x2e1   : > { %v991_v33 = vadd.f32 %v3649_v36, %v990_v32  ;;  %v1682_v32 = vld [vmem:[#allocation11 + $0x8] sm:$0xff] }
 0x2e2   : > { %v1102_v35 = vmax.f32 %v996_v31, 0.0  ;;  %v1681_v31 = vld [vmem:[#allocation11] sm:$0xff] }
 0x2e3   : > { %v1101_v34 = vmax.f32 %v991_v33, 0.0  ;;  %v1683_v33 = vld [vmem:[#allocation11 + $0x10] sm:$0xff] }
 0x2e5   : > { %2451 = vmatprep.mubr.f32.mxu1 %v1101_v34 }
 0x2e6   : > { %2452 = vmatmul.mubr.f32.gmra.mrb[44].mxu1 %v1102_v35  ;;  %v2785_v35 = vpack.c.bf16 %v1682_v32, %v1681_v31 }
 0x2e7   : > { %v2376_v37 = vpop.f32.mrb[14].mxu1 }
 0x2e8   : > { %v1006_v38 = vadd.f32 %v2376_v37, %v3649_v36  ;;  %v1000_v39 = vpop.f32.mrb[15].mxu1  ;;  %v1684_v37 = vld [vmem:[#allocation11 + $0x18] sm:$0xff]  ;;  %2786 = vmatprep.subr.bf16.mxu0 %v2785_v35  ;;  %2817 = vmatprep.subr.bf16.mxu1 %v2785_v35 }
 0x2e9   : > { %v1001_v40 = vadd.f32 %v3649_v36, %v1000_v39  ;;  %2788 = vmatpush3.bf16.msra.mxu0 %v2785_v35 }
 0x2ea   : > { %v1104_v42 = vmax.f32 %v1006_v38, 0.0 }
 0x2eb   : > { %v1103_v41 = vmax.f32 %v1001_v40, 0.0  ;;  %v2789_v40 = vpack.c.bf16 %v1684_v37, %v1683_v33 }
 0x2ed   : > { %2454 = vmatprep.mubr.f32.mxu1 %v1103_v41  ;;  %v1686_v41 = vld [vmem:[#allocation11 + $0x28] sm:$0xff]  ;;  %2790 = vmatprep.subr.bf16.mxu0 %v2789_v40 }
 0x2ee   : > { %2455 = vmatmul.mubr.f32.gmra.mrb[46].mxu1 %v1104_v42  ;;  %2792 = vmatpush3.bf16.msra.mxu0 %v2789_v40 }
 0x2ef   : > { %v2379_v43 = vpop.f32.mrb[16].mxu1 }
 0x2f0   : > { %v1016_v9 = vadd.f32 %v2379_v43, %v3649_v36  ;;  %v1010_v44 = vpop.f32.mrb[17].mxu1 }
 0x2f1   : > { %v1011_v45 = vadd.f32 %v3649_v36, %v1010_v44 }
 0x2f2   : > { %v1106_v47 = vmax.f32 %v1016_v9, 0.0 }
 0x2f3   : > { %v1105_v46 = vmax.f32 %v1011_v45, 0.0  ;;  %v1687_v45 = vld [vmem:[#allocation11 + $0x30] sm:$0xff] }
 0x2f5   : > { %2457 = vmatprep.mubr.f32.mxu1 %v1105_v46  ;;  %v1688_v46 = vld [vmem:[#allocation11 + $0x38] sm:$0xff] }
 0x2f6   : > { %2458 = vmatmul.mubr.f32.gmra.mrb[48].mxu1 %v1106_v47 }
 0x2f7   : > { %v2382_v48 = vpop.f32.mrb[18].mxu1 }
 0x2f8   : > { %v1026_v49 = vadd.f32 %v2382_v48, %v3649_v36  ;;  %v1020_v50 = vpop.f32.mrb[19].mxu1  ;;  %v2797_v48 = vpack.c.bf16 %v1688_v46, %v1687_v45 }
 0x2f9   : > { %v1021_v51 = vadd.f32 %v3649_v36, %v1020_v50 }
 0x2fa   : > { %v1108_v53 = vmax.f32 %v1026_v49, 0.0 }
 0x2fb   : > { %v1107_v52 = vmax.f32 %v1021_v51, 0.0  ;;  %v1689_v51 = vld [vmem:[#allocation11 + $0x40] sm:$0xff] }
 0x2fd   : > { %2460 = vmatprep.mubr.f32.mxu1 %v1107_v52  ;;  %v1690_v52 = vld [vmem:[#allocation11 + $0x48] sm:$0xff] }
 0x2fe   : > { %2461 = vmatmul.mubr.f32.gmra.mrb[50].mxu1 %v1108_v53 }
 0x2ff   : > { %v2385_v54 = vpop.f32.mrb[20].mxu1 }
 0x300   : > { %v1036_v55 = vadd.f32 %v2385_v54, %v3649_v36  ;;  %v1030_v56 = vpop.f32.mrb[21].mxu1 }
 0x301   : > { %v1031_v57 = vadd.f32 %v3649_v36, %v1030_v56 }
 0x302   : > { %v1110_v59 = vmax.f32 %v1036_v55, 0.0  ;;  %v2801_v55 = vpack.c.bf16 %v1690_v52, %v1689_v51 }
 0x303   : > { %v1109_v58 = vmax.f32 %v1031_v57, 0.0  ;;  %v1691_v57 = vld [vmem:[#allocation11 + $0x50] sm:$0xff] }
 0x305   : > { %2463 = vmatprep.mubr.f32.mxu1 %v1109_v58  ;;  %v1692_v58 = vld [vmem:[#allocation11 + $0x58] sm:$0xff] }
 0x306   : > { %2464 = vmatmul.mubr.f32.gmra.mrb[52].mxu1 %v1110_v59 }
 0x307   : > { %v2388_v60 = vpop.f32.mrb[22].mxu1 }
 0x308   : > { %v1046_v61 = vadd.f32 %v2388_v60, %v3649_v36  ;;  %v1040_v62 = vpop.f32.mrb[23].mxu1  ;;  %v2805_v60 = vpack.c.bf16 %v1692_v58, %v1691_v57  ;;  %v1695_v58 = vld [vmem:[#allocation11 + $0x70] sm:$0xff] }
 0x309   : > { %v1041_v63 = vadd.f32 %v3649_v36, %v1040_v62 }
 0x30a   : > { %v1112_v4 = vmax.f32 %v1046_v61, 0.0 }
 0x30b   : > { %v1111_v3 = vmax.f32 %v1041_v63, 0.0  ;;  %v1693_v63 = vld [vmem:[#allocation11 + $0x60] sm:$0xff] }
 0x30d   : > { %2466 = vmatprep.mubr.f32.mxu1 %v1111_v3  ;;  %v2809_v3 = vpack.c.bf16 %v1694_v0, %v1693_v63 }
 0x30e   : > { %2467 = vmatmul.mubr.f32.gmra.mrb[54].mxu1 %v1112_v4 }
 0x30f   : > { %v2391_v5 = vpop.f32.mrb[24].mxu1 }
 0x310   : > { %v1056_v6 = vadd.f32 %v2391_v5, %v3649_v36  ;;  %v1050_v7 = vpop.f32.mrb[25].mxu1 }
 0x311   : > { %v1051_v8 = vadd.f32 %v3649_v36, %v1050_v7 }
 0x312   : > { %v1114_v11 = vmax.f32 %v1056_v6, 0.0 }
 0x313   : > { %v1113_v10 = vmax.f32 %v1051_v8, 0.0 }
 0x315   : > { %2469 = vmatprep.mubr.f32.mxu1 %v1113_v10 }
 0x316   : > { %2470 = vmatmul.mubr.f32.gmra.mrb[56].mxu1 %v1114_v11 }
 0x317   : > { %v2394_v12 = vpop.f32.mrb[26].mxu1 }
 0x318   : > { %v1066_v13 = vadd.f32 %v2394_v12, %v3649_v36  ;;  %v1060_v14 = vpop.f32.mrb[27].mxu1 }
 0x319   : > { %v1061_v15 = vadd.f32 %v3649_v36, %v1060_v14 }
 0x31a   : > { %v1116_v17 = vmax.f32 %v1066_v13, 0.0 }
 0x31b   : > { %v1115_v16 = vmax.f32 %v1061_v15, 0.0 }
 0x31d   : > { %2472 = vmatprep.mubr.f32.mxu1 %v1115_v16 }
 0x31e   : > { %2473 = vmatmul.mubr.f32.gmra.mrb[58].mxu1 %v1116_v17 }
 0x31f   : > { %v2397_v18 = vpop.f32.mrb[28].mxu1 }
 0x320   : > { %v1076_v19 = vadd.f32 %v2397_v18, %v3649_v36  ;;  %v1070_v20 = vpop.f32.mrb[29].mxu1 }
 0x321   : > { %v1071_v21 = vadd.f32 %v3649_v36, %v1070_v20 }
 0x322   : > { %v1118_v23 = vmax.f32 %v1076_v19, 0.0 }
 0x323   : > { %v1117_v22 = vmax.f32 %v1071_v21, 0.0 }
 0x325   : > { %2475 = vmatprep.mubr.f32.mxu1 %v1117_v22 }
 0x326   : > { %2476 = vmatmul.mubr.f32.gmra.mrb[60].mxu1 %v1118_v23 }
 0x327   : > { %v2400_v24 = vpop.f32.mrb[30].mxu1 }
 0x328   : > { %v1086_v25 = vadd.f32 %v2400_v24, %v3649_v36  ;;  %v1080_v26 = vpop.f32.mrb[31].mxu1 }
 0x329   : > { %v1081_v27 = vadd.f32 %v3649_v36, %v1080_v26  ;;  %v1685_v36 = vld [vmem:[#allocation11 + $0x20] sm:$0xff] }
 0x32a   : > { %v1120_v29 = vmax.f32 %v1086_v25, 0.0  ;;  %v2793_v9 = vpack.c.bf16 %v1686_v41, %v1685_v36 }
 0x32b   : > { %v1119_v28 = vmax.f32 %v1081_v27, 0.0 }
 0x32c   : > { %2794 = vmatprep.subr.bf16.mxu0 %v2793_v9 }
 0x32d   : > { %2478 = vmatprep.mubr.f32.mxu1 %v1119_v28  ;;  %2796 = vmatpush3.bf16.msra.mxu0 %v2793_v9 }
 0x32e   : > { %2479 = vmatmul.mubr.f32.gmra.mrb[62].mxu1 %v1120_v29  ;;  %2798 = vmatprep.subr.bf16.mxu0 %v2797_v48 }
 0x331   : > { %2800 = vmatpush3.bf16.msra.mxu0 %v2797_v48 }
 0x332   : > { %2802 = vmatprep.subr.bf16.mxu0 %v2801_v55 }
 0x335   : > { %2804 = vmatpush3.bf16.msra.mxu0 %v2801_v55 }
 0x336   : > { %2806 = vmatprep.subr.bf16.mxu0 %v2805_v60 }
 0x339   : > { %2808 = vmatpush3.bf16.msra.mxu0 %v2805_v60 }
 0x33a   : > { %2810 = vmatprep.subr.bf16.mxu0 %v2809_v3 }
 0x33d   : > { %2812 = vmatpush3.bf16.msra.mxu0 %v2809_v3 }
 0x389   : > { %v2435_v34 = vpop.f32.mrb[32].mxu1 }
 0x38a   : > { %v1216_v38 = vadd.f32 %v2435_v34, %v3686_v30  ;;  %v1210_v39 = vpop.f32.mrb[33].mxu1 }
 0x38b   : > { %v1211_v42 = vadd.f32 %v3686_v30, %v1210_v39 }
 0x38c   : > { %v1370_v44 = vmax.f32 %v1216_v38, 0.0 }
 0x38d   : > { %v1369_v43 = vmax.f32 %v1211_v42, 0.0 }
 0x38f   : > { %2513 = vmatprep.mubr.f32.mxu1 %v1369_v43 }
 0x390   : > { %2514 = vmatmul.mubr.f32.vlgmr.msra.gmra.mrb[64].mxu1 %v1370_v44 }
 0x391   : > { %v2438_v47 = vpop.f32.mrb[34].mxu1  ;;  %2825 = vmatpush3.bf16.msra.mxu1 %v2785_v35 }
 0x392   : > { %v1226_v49 = vadd.f32 %v2438_v47, %v3686_v30  ;;  %v1220_v50 = vpop.f32.mrb[35].mxu1  ;;  %2818 = vmatprep.subr.bf16.mxu1 %v2789_v40 }
 0x393   : > { %v1221_v53 = vadd.f32 %v3686_v30, %v1220_v50 }
 0x394   : > { %v1372_v56 = vmax.f32 %v1226_v49, 0.0 }
 0x395   : > { %v1371_v54 = vmax.f32 %v1221_v53, 0.0  ;;  %2826 = vmatpush3.bf16.msra.mxu1 %v2789_v40 }
 0x396   : > { %2819 = vmatprep.subr.bf16.mxu1 %v2793_v9 }
 0x397   : > { %2516 = vmatprep.mubr.f32.mxu1 %v1371_v54 }
 0x398   : > { %2517 = vmatmul.mubr.f32.gmra.mrb[66].mxu1 %v1372_v56 }
 0x399   : > { %v2441_v59 = vpop.f32.mrb[36].mxu1  ;;  %2827 = vmatpush3.bf16.msra.mxu1 %v2793_v9 }
 0x39a   : > { %v1236_v61 = vadd.f32 %v2441_v59, %v3686_v30  ;;  %v1230_v62 = vpop.f32.mrb[37].mxu1  ;;  %2820 = vmatprep.subr.bf16.mxu1 %v2797_v48  ;;  %v1696_v59 = vld [vmem:[#allocation11 + $0x78] sm:$0xff] }
 0x39b   : > { %v1231_v1 = vadd.f32 %v3686_v30, %v1230_v62 }
 0x39c   : > { %v1374_v4 = vmax.f32 %v1236_v61, 0.0 }
 0x39d   : > { %v1373_v2 = vmax.f32 %v1231_v1, 0.0  ;;  %2828 = vmatpush3.bf16.msra.mxu1 %v2797_v48 }
 0x39e   : > { %2821 = vmatprep.subr.bf16.mxu1 %v2801_v55 }
 0x39f   : > { %2519 = vmatprep.mubr.f32.mxu1 %v1373_v2 }
 0x3a0   : > { %2520 = vmatmul.mubr.f32.gmra.mrb[68].mxu1 %v1374_v4 }
 0x3a1   : > { %v2444_v5 = vpop.f32.mrb[38].mxu1  ;;  %2829 = vmatpush3.bf16.msra.mxu1 %v2801_v55 }
 0x3a2   : > { %v1246_v6 = vadd.f32 %v2444_v5, %v3686_v30  ;;  %v1240_v7 = vpop.f32.mrb[39].mxu1  ;;  %2822 = vmatprep.subr.bf16.mxu1 %v2805_v60 }
 0x3a3   : > { %v1241_v8 = vadd.f32 %v3686_v30, %v1240_v7 }
 0x3a4   : > { %v1376_v11 = vmax.f32 %v1246_v6, 0.0 }
 0x3a5   : > { %v1375_v10 = vmax.f32 %v1241_v8, 0.0  ;;  %2830 = vmatpush3.bf16.msra.mxu1 %v2805_v60  ;;  %v2813_v60 = vpack.c.bf16 %v1696_v59, %v1695_v58 }
 0x3a6   : > { %2823 = vmatprep.subr.bf16.mxu1 %v2809_v3 }
 0x3a7   : > { %2522 = vmatprep.mubr.f32.mxu1 %v1375_v10  ;;  %2814 = vmatprep.subr.bf16.mxu0 %v2813_v60 }
 0x3a8   : > { %2523 = vmatmul.mubr.f32.gmra.mrb[70].mxu1 %v1376_v11  ;;  %2816 = vmatpush3.bf16.msra.mxu0 %v2813_v60 }
 0x3a9   : > { %v2447_v12 = vpop.f32.mrb[40].mxu1  ;;  %2831 = vmatpush3.bf16.msra.mxu1 %v2809_v3 }
 0x3aa   : > { %v1256_v13 = vadd.f32 %v2447_v12, %v3686_v30  ;;  %v1250_v14 = vpop.f32.mrb[41].mxu1  ;;  %2824 = vmatprep.subr.bf16.mxu1 %v2813_v60 }
 0x3ab   : > { %v1251_v15 = vadd.f32 %v3686_v30, %v1250_v14 }
 0x3ac   : > { %v1378_v17 = vmax.f32 %v1256_v13, 0.0 }
 0x3ad   : > { %v1377_v16 = vmax.f32 %v1251_v15, 0.0  ;;  %2832 = vmatpush3.bf16.msra.mxu1 %v2813_v60 }
 0x3af   : > { %2525 = vmatprep.mubr.f32.mxu1 %v1377_v16 }
 0x3b0   : > { %2526 = vmatmul.mubr.f32.gmra.mrb[72].mxu1 %v1378_v17 }
 0x3b1   : > { %v2450_v18 = vpop.f32.mrb[42].mxu1 }
 0x3b2   : > { %v1266_v19 = vadd.f32 %v2450_v18, %v3686_v30  ;;  %v1260_v20 = vpop.f32.mrb[43].mxu1 }
 0x3b3   : > { %v1261_v21 = vadd.f32 %v3686_v30, %v1260_v20 }
 0x3b4   : > { %v1380_v23 = vmax.f32 %v1266_v19, 0.0 }
 0x3b5   : > { %v1379_v22 = vmax.f32 %v1261_v21, 0.0 }
 0x3b7   : > { %2528 = vmatprep.mubr.f32.mxu1 %v1379_v22 }
 0x3b8   : > { %2529 = vmatmul.mubr.f32.gmra.mrb[74].mxu1 %v1380_v23 }
 0x3b9   : > { %v2453_v24 = vpop.f32.mrb[44].mxu1 }
 0x3ba   : > { %v1276_v25 = vadd.f32 %v2453_v24, %v3686_v30  ;;  %v1270_v26 = vpop.f32.mrb[45].mxu1  ;;  %v3723_v24 = vld [vmem:[%s3916_s1] ss:$0 sm:$0xff]  ;;  %s3198_s1 = smov [#allocation13]  }
 0x3bb   : > { %v1271_v27 = vadd.f32 %v3686_v30, %v1270_v26  ;;  %s3111_s21 = sshll.u32 %s3198_s1, 4  ;;  %s3112_s21 = int_to_ptr.vmem [resolvable:$false] %s3111_s21 }
 0x3bc   : > { %v1382_v29 = vmax.f32 %v1276_v25, 0.0  ;;  %s3113_s28 = scalar_lea.vmem %s3112_s21, 8192  ;;  %p3114_p13 = scmp.lt.s32.totalorder %s3833_s26, %s3112_s21 }
 0x3bd   : > { %v1381_v28 = vmax.f32 %v1271_v27, 0.0  ;;  %p3115_p0 = scmp.lt.s32.totalorder %s3113_s28, %s3107_s15 }
 0x3bf   : > { %2531 = vmatprep.mubr.f32.mxu1 %v1381_v28  ;;  %p3116_p2 = por %p3115_p0, %p3114_p13 }
 0x3c0   : > { %2532 = vmatmul.mubr.f32.gmra.mrb[76].mxu1 %v1382_v29 }
 0x3c1   : > { %v2456_v31 = vpop.f32.mrb[46].mxu1  ;;  %p3117_p8 = pnand %p3116_p2, %p3110_p1 }
 0x3c2   : > { %v1286_v32 = vadd.f32 %v2456_v31, %v3686_v30  ;;  %v1280_v33 = vpop.f32.mrb[47].mxu1 }
 0x3c3   : > { %v1281_v34 = vadd.f32 %v3686_v30, %v1280_v33 }
 0x3c4   : > { %v1384_v37 = vmax.f32 %v1286_v32, 0.0 }
 0x3c5   : > { %v1383_v35 = vmax.f32 %v1281_v34, 0.0 }
 0x3c7   : > { %2534 = vmatprep.mubr.f32.mxu1 %v1383_v35 }
 0x3c8   : > { %2535 = vmatmul.mubr.f32.gmra.mrb[78].mxu1 %v1384_v37 }
 0x3c9   : > { %v2459_v38 = vpop.f32.mrb[48].mxu1 }
 0x3ca   : > { %v1296_v39 = vadd.f32 %v2459_v38, %v3686_v30  ;;  %v1290_v40 = vpop.f32.mrb[49].mxu1 }
 0x3cb   : > { %v1291_v36 = vadd.f32 %v3686_v30, %v1290_v40 }
 0x3cc   : > { %v1386_v42 = vmax.f32 %v1296_v39, 0.0 }
 0x3cd   : > { %v1385_v41 = vmax.f32 %v1291_v36, 0.0 }
 0x3cf   : > { %2537 = vmatprep.mubr.f32.mxu1 %v1385_v41 }
 0x3d0   : > { %2538 = vmatmul.mubr.f32.gmra.mrb[80].mxu1 %v1386_v42 }
 0x3d1   : > { %v2462_v43 = vpop.f32.mrb[50].mxu1 }
 0x3d2   : > { %v1306_v9 = vadd.f32 %v2462_v43, %v3686_v30  ;;  %v1300_v44 = vpop.f32.mrb[51].mxu1 }
 0x3d3   : > { %v1301_v45 = vadd.f32 %v3686_v30, %v1300_v44 }
 0x3d4   : > { %v1388_v47 = vmax.f32 %v1306_v9, 0.0 }
 0x3d5   : > { %v1387_v46 = vmax.f32 %v1301_v45, 0.0 }
 0x3d7   : > { %2540 = vmatprep.mubr.f32.mxu1 %v1387_v46 }
 0x3d8   : > { %2541 = vmatmul.mubr.f32.gmra.mrb[82].mxu1 %v1388_v47 }
 0x3d9   : > { %v2465_v48 = vpop.f32.mrb[52].mxu1 }
 0x3da   : > { %v1316_v49 = vadd.f32 %v2465_v48, %v3686_v30  ;;  %v1310_v50 = vpop.f32.mrb[53].mxu1 }
 0x3db   : > { %v1311_v51 = vadd.f32 %v3686_v30, %v1310_v50 }
 0x3dc   : > { %v1390_v53 = vmax.f32 %v1316_v49, 0.0 }
 0x3dd   : > { %v1389_v52 = vmax.f32 %v1311_v51, 0.0 }
 0x3df   : > { %2543 = vmatprep.mubr.f32.mxu1 %v1389_v52 }
 0x3e0   : > { %2544 = vmatmul.mubr.f32.gmra.mrb[84].mxu1 %v1390_v53 }
 0x3e1   : > { %v2468_v54 = vpop.f32.mrb[54].mxu1 }
 0x3e2   : > { %v1326_v55 = vadd.f32 %v2468_v54, %v3686_v30  ;;  %v1320_v56 = vpop.f32.mrb[55].mxu1 }
 0x3e3   : > { %v1321_v57 = vadd.f32 %v3686_v30, %v1320_v56 }
 0x3e4   : > { %v1392_v62 = vmax.f32 %v1326_v55, 0.0 }
 0x3e5   : > { %v1391_v61 = vmax.f32 %v1321_v57, 0.0 }
 0x3e7   : > { %2546 = vmatprep.mubr.f32.mxu1 %v1391_v61 }
 0x3e8   : > { %2547 = vmatmul.mubr.f32.gmra.mrb[86].mxu1 %v1392_v62 }
 0x3e9   : > { %v2471_v63 = vpop.f32.mrb[56].mxu1 }
 0x3ea   : > { %v1336_v0 = vadd.f32 %v2471_v63, %v3686_v30  ;;  %v1330_v1 = vpop.f32.mrb[57].mxu1 }
 0x3eb   : > { %v1331_v2 = vadd.f32 %v3686_v30, %v1330_v1 }
 0x3ec   : > { %v1394_v4 = vmax.f32 %v1336_v0, 0.0 }
 0x3ed   : > { %v1393_v3 = vmax.f32 %v1331_v2, 0.0 }
 0x3ef   : > { %2549 = vmatprep.mubr.f32.mxu1 %v1393_v3 }
 0x3f0   : > { %2550 = vmatmul.mubr.f32.gmra.mrb[88].mxu1 %v1394_v4 }
 0x3f1   : > { %v2474_v5 = vpop.f32.mrb[58].mxu1 }
 0x3f2   : > { %v1346_v6 = vadd.f32 %v2474_v5, %v3686_v30  ;;  %v1340_v7 = vpop.f32.mrb[59].mxu1 }
 0x3f3   : > { %v1341_v8 = vadd.f32 %v3686_v30, %v1340_v7 }
 0x3f4   : > { %v1396_v11 = vmax.f32 %v1346_v6, 0.0 }
 0x3f5   : > { %v1395_v10 = vmax.f32 %v1341_v8, 0.0 }
 0x3f7   : > { %2552 = vmatprep.mubr.f32.mxu1 %v1395_v10 }
 0x3f8   : > { %2553 = vmatmul.mubr.f32.gmra.mrb[90].mxu1 %v1396_v11 }
 0x3f9   : > { %v2477_v12 = vpop.f32.mrb[60].mxu1 }
 0x3fa   : > { %v1356_v13 = vadd.f32 %v2477_v12, %v3686_v30  ;;  %v1350_v14 = vpop.f32.mrb[61].mxu1 }
 0x3fb   : > { %v1351_v15 = vadd.f32 %v3686_v30, %v1350_v14 }
 0x3fc   : > { %v1398_v17 = vmax.f32 %v1356_v13, 0.0 }
 0x3fd   : > { %v1397_v16 = vmax.f32 %v1351_v15, 0.0 }
 0x3ff   : > { %2555 = vmatprep.mubr.f32.mxu1 %v1397_v16 }
 0x400   : > { %2556 = vmatmul.mubr.f32.gmra.mrb[92].mxu1 %v1398_v17 }
 0x401   : > { %v2480_v18 = vpop.f32.mrb[62].mxu1 }
 0x402   : > { %v1366_v19 = vadd.f32 %v2480_v18, %v3686_v30  ;;  %v1360_v20 = vpop.f32.mrb[63].mxu1 }
 0x403   : > { %v1361_v21 = vadd.f32 %v3686_v30, %v1360_v20 }
 0x404   : > { %v1400_v23 = vmax.f32 %v1366_v19, 0.0 }
 0x405   : > { %v1399_v22 = vmax.f32 %v1361_v21, 0.0 }
 0x407   : > { %2558 = vmatprep.mubr.f32.mxu1 %v1399_v22 }
 0x408   : > { %2559 = vmatmul.mubr.f32.gmra.mrb[94].mxu1 %v1400_v23 }
 0x463   : > { %v2515_v25 = vpop.f32.mrb[64].mxu1 }
 0x464   : > { %v1496_v26 = vadd.f32 %v2515_v25, %v3723_v24  ;;  %v1490_v27 = vpop.f32.mrb[65].mxu1 }
 0x465   : > { %v1491_v28 = vadd.f32 %v3723_v24, %v1490_v27 }
 0x466   : > { %v1650_v31 = vmax.f32 %v1496_v26, 0.0 }
 0x467   : > { %v1649_v29 = vmax.f32 %v1491_v28, 0.0 }
 0x469   : > { %2593 = vmatprep.mubr.f32.mxu0 %v1649_v29 }
 0x46a   : > { %2594 = vmatmul.mubr.f32.vlgmr.msra.gmra.mrb[64].mxu0 %v1650_v31 }
 0x46b   : > { %v2518_v30 = vpop.f32.mrb[66].mxu1 }
 0x46c   : > { %v1506_v32 = vadd.f32 %v2518_v30, %v3723_v24  ;;  %v1500_v33 = vpop.f32.mrb[67].mxu1 }
 0x46d   : > { %v1501_v34 = vadd.f32 %v3723_v24, %v1500_v33 }
 0x46e   : > { %v1652_v37 = vmax.f32 %v1506_v32, 0.0 }
 0x46f   : > { %v1651_v35 = vmax.f32 %v1501_v34, 0.0 }
 0x471   : > { %2596 = vmatprep.mubr.f32.mxu0 %v1651_v35 }
 0x472   : > { %2597 = vmatmul.mubr.f32.gmra.mrb[66].mxu0 %v1652_v37 }
 0x473   : > { %v2521_v38 = vpop.f32.mrb[68].mxu1 }
 0x474   : > { %v1516_v39 = vadd.f32 %v2521_v38, %v3723_v24  ;;  %v1510_v40 = vpop.f32.mrb[69].mxu1 }
 0x475   : > { %v1511_v36 = vadd.f32 %v3723_v24, %v1510_v40 }
 0x476   : > { %v1654_v42 = vmax.f32 %v1516_v39, 0.0 }
 0x477   : > { %v1653_v41 = vmax.f32 %v1511_v36, 0.0 }
 0x479   : > { %2599 = vmatprep.mubr.f32.mxu0 %v1653_v41 }
 0x47a   : > { %2600 = vmatmul.mubr.f32.gmra.mrb[68].mxu0 %v1654_v42 }
 0x47b   : > { %v2524_v43 = vpop.f32.mrb[70].mxu1 }
 0x47c   : > { %v1526_v9 = vadd.f32 %v2524_v43, %v3723_v24  ;;  %v1520_v44 = vpop.f32.mrb[71].mxu1 }
 0x47d   : > { %v1521_v45 = vadd.f32 %v3723_v24, %v1520_v44 }
 0x47e   : > { %v1656_v47 = vmax.f32 %v1526_v9, 0.0 }
 0x47f   : > { %v1655_v46 = vmax.f32 %v1521_v45, 0.0 }
 0x481   : > { %2602 = vmatprep.mubr.f32.mxu0 %v1655_v46 }
 0x482   : > { %2603 = vmatmul.mubr.f32.gmra.mrb[70].mxu0 %v1656_v47 }
 0x483   : > { %v2527_v48 = vpop.f32.mrb[72].mxu1 }
 0x484   : > { %v1536_v49 = vadd.f32 %v2527_v48, %v3723_v24  ;;  %v1530_v50 = vpop.f32.mrb[73].mxu1 }
 0x485   : > { %v1531_v51 = vadd.f32 %v3723_v24, %v1530_v50 }
 0x486   : > { %v1658_v53 = vmax.f32 %v1536_v49, 0.0 }
 0x487   : > { %v1657_v52 = vmax.f32 %v1531_v51, 0.0 }
 0x489   : > { %2605 = vmatprep.mubr.f32.mxu0 %v1657_v52 }
 0x48a   : > { %2606 = vmatmul.mubr.f32.gmra.mrb[72].mxu0 %v1658_v53 }
 0x48b   : > { %v2530_v54 = vpop.f32.mrb[74].mxu1 }
 0x48c   : > { %v1546_v55 = vadd.f32 %v2530_v54, %v3723_v24  ;;  %v1540_v56 = vpop.f32.mrb[75].mxu1 }
 0x48d   : > { %v1541_v57 = vadd.f32 %v3723_v24, %v1540_v56 }
 0x48e   : > { %v1660_v59 = vmax.f32 %v1546_v55, 0.0 }
 0x48f   : > { %v1659_v58 = vmax.f32 %v1541_v57, 0.0  ;;  %v3761_v57 = vld [vmem:[%s3917_s22] ss:$0 sm:$0xff] }
 0x491   : > { %2608 = vmatprep.mubr.f32.mxu0 %v1659_v58 }
 0x492   : > { %2609 = vmatmul.mubr.f32.gmra.mrb[74].mxu0 %v1660_v59 }
 0x493   : > { %v2533_v60 = vpop.f32.mrb[76].mxu1 }
 0x494   : > { %v1556_v61 = vadd.f32 %v2533_v60, %v3723_v24  ;;  %v1550_v62 = vpop.f32.mrb[77].mxu1 }
 0x495   : > { %v1551_v63 = vadd.f32 %v3723_v24, %v1550_v62 }
 0x496   : > { %v1662_v1 = vmax.f32 %v1556_v61, 0.0 }
 0x497   : > { %v1661_v0 = vmax.f32 %v1551_v63, 0.0 }
 0x499   : > { %2611 = vmatprep.mubr.f32.mxu0 %v1661_v0 }
 0x49a   : > { %2612 = vmatmul.mubr.f32.gmra.mrb[76].mxu0 %v1662_v1 }
 0x49b   : > { %v2536_v2 = vpop.f32.mrb[78].mxu1 }
 0x49c   : > { %v1566_v3 = vadd.f32 %v2536_v2, %v3723_v24  ;;  %v1560_v4 = vpop.f32.mrb[79].mxu1 }
 0x49d   : > { %v1561_v5 = vadd.f32 %v3723_v24, %v1560_v4 }
 0x49e   : > { %v1664_v7 = vmax.f32 %v1566_v3, 0.0 }
 0x49f   : > { %v1663_v6 = vmax.f32 %v1561_v5, 0.0 }
 0x4a1   : > { %2614 = vmatprep.mubr.f32.mxu0 %v1663_v6 }
 0x4a2   : > { %2615 = vmatmul.mubr.f32.gmra.mrb[78].mxu0 %v1664_v7 }
 0x4a3   : > { %v2539_v8 = vpop.f32.mrb[80].mxu1 }
 0x4a4   : > { %v1576_v10 = vadd.f32 %v2539_v8, %v3723_v24  ;;  %v1570_v11 = vpop.f32.mrb[81].mxu1 }
 0x4a5   : > { %v1571_v12 = vadd.f32 %v3723_v24, %v1570_v11 }
 0x4a6   : > { %v1666_v14 = vmax.f32 %v1576_v10, 0.0 }
 0x4a7   : > { %v1665_v13 = vmax.f32 %v1571_v12, 0.0 }
 0x4a9   : > { %2617 = vmatprep.mubr.f32.mxu0 %v1665_v13 }
 0x4aa   : > { %2618 = vmatmul.mubr.f32.gmra.mrb[80].mxu0 %v1666_v14 }
 0x4ab   : > { %v2542_v15 = vpop.f32.mrb[82].mxu1 }
 0x4ac   : > { %v1586_v16 = vadd.f32 %v2542_v15, %v3723_v24  ;;  %v1580_v17 = vpop.f32.mrb[83].mxu1 }
 0x4ad   : > { %v1581_v18 = vadd.f32 %v3723_v24, %v1580_v17 }
 0x4ae   : > { %v1668_v20 = vmax.f32 %v1586_v16, 0.0 }
 0x4af   : > { %v1667_v19 = vmax.f32 %v1581_v18, 0.0 }
 0x4b1   : > { %2620 = vmatprep.mubr.f32.mxu0 %v1667_v19 }
 0x4b2   : > { %2621 = vmatmul.mubr.f32.gmra.mrb[82].mxu0 %v1668_v20 }
 0x4b3   : > { %v2545_v21 = vpop.f32.mrb[84].mxu1 }
 0x4b4   : > { %v1596_v22 = vadd.f32 %v2545_v21, %v3723_v24  ;;  %v1590_v23 = vpop.f32.mrb[85].mxu1 }
 0x4b5   : > { %v1591_v25 = vadd.f32 %v3723_v24, %v1590_v23 }
 0x4b6   : > { %v1670_v27 = vmax.f32 %v1596_v22, 0.0 }
 0x4b7   : > { %v1669_v26 = vmax.f32 %v1591_v25, 0.0 }
 0x4b9   : > { %2623 = vmatprep.mubr.f32.mxu0 %v1669_v26 }
 0x4ba   : > { %2624 = vmatmul.mubr.f32.gmra.mrb[84].mxu0 %v1670_v27 }
 0x4bb   : > { %v2548_v28 = vpop.f32.mrb[86].mxu1 }
 0x4bc   : > { %v1606_v29 = vadd.f32 %v2548_v28, %v3723_v24  ;;  %v1600_v31 = vpop.f32.mrb[87].mxu1 }
 0x4bd   : > { %v1601_v30 = vadd.f32 %v3723_v24, %v1600_v31 }
 0x4be   : > { %v1672_v33 = vmax.f32 %v1606_v29, 0.0 }
 0x4bf   : > { %v1671_v32 = vmax.f32 %v1601_v30, 0.0 }
 0x4c1   : > { %2626 = vmatprep.mubr.f32.mxu0 %v1671_v32 }
 0x4c2   : > { %2627 = vmatmul.mubr.f32.gmra.mrb[86].mxu0 %v1672_v33 }
 0x4c3   : > { %v2551_v34 = vpop.f32.mrb[88].mxu1 }
 0x4c4   : > { %v1616_v35 = vadd.f32 %v2551_v34, %v3723_v24  ;;  %v1610_v37 = vpop.f32.mrb[89].mxu1 }
 0x4c5   : > { %v1611_v38 = vadd.f32 %v3723_v24, %v1610_v37 }
 0x4c6   : > { %v1674_v40 = vmax.f32 %v1616_v35, 0.0 }
 0x4c7   : > { %v1673_v39 = vmax.f32 %v1611_v38, 0.0 }
 0x4c9   : > { %2629 = vmatprep.mubr.f32.mxu1 %v1673_v39 }
 0x4ca   : > { %2630 = vmatmul.mubr.f32.vlgmr.msra.gmra.mrb[96].mxu1 %v1674_v40 }
 0x4cb   : > { %v2554_v36 = vpop.f32.mrb[90].mxu1 }
 0x4cc   : > { %v1626_v41 = vadd.f32 %v2554_v36, %v3723_v24  ;;  %v1620_v42 = vpop.f32.mrb[91].mxu1 }
 0x4cd   : > { %v1621_v43 = vadd.f32 %v3723_v24, %v1620_v42 }
 0x4ce   : > { %v1676_v44 = vmax.f32 %v1626_v41, 0.0 }
 0x4cf   : > { %v1675_v9 = vmax.f32 %v1621_v43, 0.0 }
 0x4d1   : > { %2632 = vmatprep.mubr.f32.mxu1 %v1675_v9 }
 0x4d2   : > { %2633 = vmatmul.mubr.f32.gmra.mrb[98].mxu1 %v1676_v44 }
 0x4d3   : > { %v2557_v45 = vpop.f32.mrb[92].mxu1 }
 0x4d4   : > { %v1636_v46 = vadd.f32 %v2557_v45, %v3723_v24  ;;  %v1630_v47 = vpop.f32.mrb[93].mxu1 }
 0x4d5   : > { %v1631_v48 = vadd.f32 %v3723_v24, %v1630_v47 }
 0x4d6   : > { %v1678_v50 = vmax.f32 %v1636_v46, 0.0 }
 0x4d7   : > { %v1677_v49 = vmax.f32 %v1631_v48, 0.0 }
 0x4d9   : > { %2635 = vmatprep.mubr.f32.mxu1 %v1677_v49 }
 0x4da   : > { %2636 = vmatmul.mubr.f32.gmra.mrb[100].mxu1 %v1678_v50 }
 0x4db   : > { %v2560_v51 = vpop.f32.mrb[94].mxu1 }
 0x4dc   : > { %v1646_v52 = vadd.f32 %v2560_v51, %v3723_v24  ;;  %v1640_v53 = vpop.f32.mrb[95].mxu1 }
 0x4dd   : > { %v1641_v54 = vadd.f32 %v3723_v24, %v1640_v53 }
 0x4de   : > { %v1680_v56 = vmax.f32 %v1646_v52, 0.0 }
 0x4df   : > { %v1679_v55 = vmax.f32 %v1641_v54, 0.0 }
 0x4e1   : > { %2638 = vmatprep.mubr.f32.mxu1 %v1679_v55 }
 0x4e2   : > { %2639 = vmatmul.mubr.f32.gmra.mrb[102].mxu1 %v1680_v56 }
 0x53d   : > { %v2595_v58 = vpop.f32.mrb[64].mxu0 }
 0x53e   : > { %v1776_v59 = vadd.f32 %v2595_v58, %v3761_v57  ;;  %v1770_v60 = vpop.f32.mrb[65].mxu0 }
 0x53f   : > { %v1771_v61 = vadd.f32 %v3761_v57, %v1770_v60 }
 0x540   : > { %1930 = vst [vmem:[%s3765_s24 + $0x8] sm:$0xff] %v1776_v59 }
 0x541   : > { %1929 = vst [vmem:[%s3765_s24] sm:$0xff] %v1771_v61 }
 0x545   : > { %v2598_v24 = vpop.f32.mrb[66].mxu0 }
 0x546   : > { %v1786_v62 = vadd.f32 %v2598_v24, %v3761_v57  ;;  %v1780_v63 = vpop.f32.mrb[67].mxu0 }
 0x547   : > { %v1781_v0 = vadd.f32 %v3761_v57, %v1780_v63 }
 0x548   : > { %1932 = vst [vmem:[%s3765_s24 + $0x18] sm:$0xff] %v1786_v62 }
 0x549   : > { %1931 = vst [vmem:[%s3765_s24 + $0x10] sm:$0xff] %v1781_v0 }
 0x54d   : > { %v2601_v1 = vpop.f32.mrb[68].mxu0 }
 0x54e   : > { %v1796_v2 = vadd.f32 %v2601_v1, %v3761_v57  ;;  %v1790_v3 = vpop.f32.mrb[69].mxu0 }
 0x54f   : > { %v1791_v4 = vadd.f32 %v3761_v57, %v1790_v3 }
 0x550   : > { %1934 = vst [vmem:[%s3765_s24 + $0x28] sm:$0xff] %v1796_v2 }
 0x551   : > { %1933 = vst [vmem:[%s3765_s24 + $0x20] sm:$0xff] %v1791_v4 }
 0x555   : > { %v2604_v5 = vpop.f32.mrb[70].mxu0 }
 0x556   : > { %v1806_v6 = vadd.f32 %v2604_v5, %v3761_v57  ;;  %v1800_v7 = vpop.f32.mrb[71].mxu0 }
 0x557   : > { %v1801_v8 = vadd.f32 %v3761_v57, %v1800_v7 }
 0x558   : > { %1936 = vst [vmem:[%s3765_s24 + $0x38] sm:$0xff] %v1806_v6 }
 0x559   : > { %1935 = vst [vmem:[%s3765_s24 + $0x30] sm:$0xff] %v1801_v8 }
 0x55d   : > { %v2607_v10 = vpop.f32.mrb[72].mxu0 }
 0x55e   : > { %v1816_v11 = vadd.f32 %v2607_v10, %v3761_v57  ;;  %v1810_v12 = vpop.f32.mrb[73].mxu0 }
 0x55f   : > { %v1811_v13 = vadd.f32 %v3761_v57, %v1810_v12 }
 0x560   : > { %1938 = vst [vmem:[%s3765_s24 + $0x48] sm:$0xff] %v1816_v11 }
 0x561   : > { %1937 = vst [vmem:[%s3765_s24 + $0x40] sm:$0xff] %v1811_v13 }
 0x565   : > { %v2610_v14 = vpop.f32.mrb[74].mxu0 }
 0x566   : > { %v1826_v15 = vadd.f32 %v2610_v14, %v3761_v57  ;;  %v1820_v16 = vpop.f32.mrb[75].mxu0 }
 0x567   : > { %v1821_v17 = vadd.f32 %v3761_v57, %v1820_v16 }
 0x568   : > { %1940 = vst [vmem:[%s3765_s24 + $0x58] sm:$0xff] %v1826_v15 }
 0x569   : > { %1939 = vst [vmem:[%s3765_s24 + $0x50] sm:$0xff] %v1821_v17 }
 0x56d   : > { %v2613_v18 = vpop.f32.mrb[76].mxu0 }
 0x56e   : > { %v1836_v19 = vadd.f32 %v2613_v18, %v3761_v57  ;;  %v1830_v20 = vpop.f32.mrb[77].mxu0 }
 0x56f   : > { %v1831_v21 = vadd.f32 %v3761_v57, %v1830_v20 }
 0x570   : > { %1942 = vst [vmem:[%s3765_s24 + $0x68] sm:$0xff] %v1836_v19 }
 0x571   : > { %1941 = vst [vmem:[%s3765_s24 + $0x60] sm:$0xff] %v1831_v21 }
 0x575   : > { %v2616_v22 = vpop.f32.mrb[78].mxu0 }
 0x576   : > { %v1846_v23 = vadd.f32 %v2616_v22, %v3761_v57  ;;  %v1840_v25 = vpop.f32.mrb[79].mxu0 }
 0x577   : > { %v1841_v26 = vadd.f32 %v3761_v57, %v1840_v25 }
 0x578   : > { %1944 = vst [vmem:[%s3765_s24 + $0x78] sm:$0xff] %v1846_v23 }
 0x579   : > { %1943 = vst [vmem:[%s3765_s24 + $0x70] sm:$0xff] %v1841_v26 }
 0x57d   : > { %v2619_v27 = vpop.f32.mrb[80].mxu0 }
 0x57e   : > { %v1856_v28 = vadd.f32 %v2619_v27, %v3761_v57  ;;  %v1850_v29 = vpop.f32.mrb[81].mxu0 }
 0x57f   : > { %v1851_v31 = vadd.f32 %v3761_v57, %v1850_v29 }
 0x580   : > { %1946 = vst [vmem:[%s3765_s24 + $0x88] sm:$0xff] %v1856_v28 }
 0x581   : > { %1945 = vst [vmem:[%s3765_s24 + $0x80] sm:$0xff] %v1851_v31 }
 0x585   : > { %v2622_v30 = vpop.f32.mrb[82].mxu0 }
 0x586   : > { %v1866_v32 = vadd.f32 %v2622_v30, %v3761_v57  ;;  %v1860_v33 = vpop.f32.mrb[83].mxu0 }
 0x587   : > { %v1861_v34 = vadd.f32 %v3761_v57, %v1860_v33 }
 0x588   : > { %1948 = vst [vmem:[%s3765_s24 + $0x98] sm:$0xff] %v1866_v32 }
 0x589   : > { %1947 = vst [vmem:[%s3765_s24 + $0x90] sm:$0xff] %v1861_v34 }
 0x58d   : > { %v2625_v35 = vpop.f32.mrb[84].mxu0 }
 0x58e   : > { %v1876_v37 = vadd.f32 %v2625_v35, %v3761_v57  ;;  %v1870_v38 = vpop.f32.mrb[85].mxu0 }
 0x58f   : > { %v1871_v39 = vadd.f32 %v3761_v57, %v1870_v38 }
 0x590   : > { %1950 = vst [vmem:[%s3765_s24 + $0xa8] sm:$0xff] %v1876_v37 }
 0x591   : > { %1949 = vst [vmem:[%s3765_s24 + $0xa0] sm:$0xff] %v1871_v39 }
 0x595   : > { %v2628_v40 = vpop.f32.mrb[86].mxu0 }
 0x596   : > { %v1886_v36 = vadd.f32 %v2628_v40, %v3761_v57  ;;  %v1880_v41 = vpop.f32.mrb[87].mxu0 }
 0x597   : > { %v1881_v42 = vadd.f32 %v3761_v57, %v1880_v41 }
 0x598   : > { %1952 = vst [vmem:[%s3765_s24 + $0xb8] sm:$0xff] %v1886_v36 }
 0x599   : > { %1951 = vst [vmem:[%s3765_s24 + $0xb0] sm:$0xff] %v1881_v42 }
 0x59d   : > { %v2631_v43 = vpop.f32.mrb[96].mxu1 }
 0x59e   : > { %v1896_v9 = vadd.f32 %v2631_v43, %v3761_v57  ;;  %v1890_v44 = vpop.f32.mrb[97].mxu1 }
 0x59f   : > { %v1891_v45 = vadd.f32 %v3761_v57, %v1890_v44 }
 0x5a0   : > { %1954 = vst [vmem:[%s3765_s24 + $0xc8] sm:$0xff] %v1896_v9 }
 0x5a1   : > { %1953 = vst [vmem:[%s3765_s24 + $0xc0] sm:$0xff] %v1891_v45 }
 0x5a5   : > { %v2634_v46 = vpop.f32.mrb[98].mxu1 }
 0x5a6   : > { %v1906_v47 = vadd.f32 %v2634_v46, %v3761_v57  ;;  %v1900_v48 = vpop.f32.mrb[99].mxu1 }
 0x5a7   : > { %v1901_v49 = vadd.f32 %v3761_v57, %v1900_v48 }
 0x5a8   : > { %1956 = vst [vmem:[%s3765_s24 + $0xd8] sm:$0xff] %v1906_v47 }
 0x5a9   : > { %1955 = vst [vmem:[%s3765_s24 + $0xd0] sm:$0xff] %v1901_v49 }
 0x5ad   : > { %v2637_v50 = vpop.f32.mrb[100].mxu1 }
 0x5ae   : > { %v1916_v51 = vadd.f32 %v2637_v50, %v3761_v57  ;;  %v1910_v52 = vpop.f32.mrb[101].mxu1 }
 0x5af   : > { %v1911_v53 = vadd.f32 %v3761_v57, %v1910_v52 }
 0x5b0   : > { %1958 = vst [vmem:[%s3765_s24 + $0xe8] sm:$0xff] %v1916_v51 }
 0x5b1   : > { %1957 = vst [vmem:[%s3765_s24 + $0xe0] sm:$0xff] %v1911_v53 }
 0x5b5   : > { %v2640_v54 = vpop.f32.mrb[102].mxu1 }
 0x5b6   : > { %v1926_v55 = vadd.f32 %v2640_v54, %v3761_v57  ;;  %v1920_v56 = vpop.f32.mrb[103].mxu1 }
 0x5b7   : > { %v1921_v58 = vadd.f32 %v3761_v57, %v1920_v56 }
 0x5b8   : > { %1960 = vst [vmem:[%s3765_s24 + $0xf8] sm:$0xff] %v1926_v55 }
 0x5b9   : > { %1959 = vst [vmem:[%s3765_s24 + $0xf0] sm:$0xff] %v1921_v58 }
 0x5ba   : > { %3120 = shalt.err (!%p3117_p8)
}
 0x5bb   : > { %s3121_s12 = scalar_lea.hbm %s3831_s8, 4096  ;;  %s3125_s13 = scalar_lea.hbm %s3918_s27, 8192 }
 0x5bc   : > { %p3122_p6 = scmp.ne.s32.totalorder %s3831_s8, %s3121_s12  ;;  %p3126_p3 = scmp.lt.u32.totalorder %s3831_s8, %s3918_s27 }
 0x5bd   : > { %p3127_p5 = scmp.lt.u32.totalorder %s3125_s13, %s3121_s12  ;;  %p3129_p7 = scmp.lt.u32.totalorder %s3121_s12, %s3831_s8 }
 0x5be   : > { %p3123_p10 = pnand %p3122_p6, %p3919_p4 }
 0x5bf   : > { %p3128_p9 = por %p3127_p5, %p3126_p3 }
 0x5c0   : > { %p3124_p11 = pneg %p3123_p10 }
 0x5c1   : > { %p3130_p12 = por %p3129_p7, %p3128_p9 }
 0x5c3   : > { %p3131_p1 = pnand %p3130_p12, %p3124_p11 }
 0x5c5   : > { %3134 = shalt.err (!%p3131_p1)
}
 0x5c6   : > { %s3199_s15 = smov 128   ;;  %s3200_s1 = smov 8  }
 0x5c7   : > { %2855 = dma.vmem_to_hbm [thread:$0]  (%p3919_p4), %s3833_s26, 4096, %s3831_s8, %s1962_s23, %s3199_s15, %s3199_s15, %s3200_s1  }
 0x5c8 PF: > { %s1990_s21 = sand.u32 1, %s3173_s17   ;;  %p3920_p13 = scmp.ne.s32.totalorder %s3907_s14, 0 }
 0x5c9   : > { %p3921_p0 = scmp.ge.s32.totalorder %s3185_s20, 2  ;;  %s1991_s28 = scalar_lea.sflag [#allocation4], %s1990_s21 }
 0x5cb   : > { %p2878_p2 = pnand %p3921_p0, %p3920_p13 }
 0x5cd   : > { %3168 = dma.done.wait (!%p2878_p2), %s1991_s28, 4096  }
 0x5ce   : > { %3170 = vsyncadd (!%p2878_p2), %s1991_s28, 4294963200  ;;  %p27_p8 = scmp.ge.s32.totalorder %s3434_s16, 4   ;;  %s3922_s17 = smov %s3177_s18 }
 0x5cf   : > { %s3923_s18 = smov %s3181_s19  ;;  %s3924_s19 = smov %s3446_s10 }
 0x5d0   : > { %s3925_s20 = smov %s3434_s16  ;;  %29 = sbr.rel (!%p27_p8) target bundleno = 13 (0xd), region = 129 }
 0x5d7   :  { %1996 = vsyncpa [#allocation3], 1 }
 0x5d8   :  { %1998 = vsyncpa [#allocation3 + $0x1], 1 }
 0x5d9   :  { %1999 = vsyncpa [#allocation6], 1 }
 0x5da   :  { %2000 = vsyncpa [#allocation9], 1 }
 0x5db   :  { %2001 = vsyncpa [#allocation12], 1 }
 0x5dc   :  { %2002 = vsyncpa [#allocation4], 1 }
 0x5dd   :  { %2004 = vsyncpa [#allocation4 + $0x1], 1 }

</bundles_post_ra>
